<compile_context>
chip_gen: v7x
topology: tpu7x:2x2x1
jax: 0.10.0
libtpu: 0.0.40
codegen_flags: <defaults>
</compile_context>

<pallas_src>
import functools
import math

import numpy as np
import jax
import jax.numpy as jnp
from jax import lax
from jax.experimental import pallas as pl
from jax.experimental.pallas import tpu as pltpu


def _layer_norm(y, g, b, eps=1e-5):
    mu = jnp.mean(y, axis=-1, keepdims=True)
    c = y - mu
    var = jnp.mean(c * c, axis=-1, keepdims=True)
    return c * lax.rsqrt(var + eps) * g + b


def _pick_batch_tile(B, S, max_rows=512):
    """Largest batch tile (divisor of B) whose row block stays sublane-legal."""
    if B * S <= max_rows:
        return B                                  # whole batch in one grid step
    best = B                                      # always-legal fallback (full extent)
    for tb in range(1, B):
        if B % tb == 0 and tb * S <= max_rows and (tb * S) % 8 == 0:
            best = tb                             # keep the largest qualifying tile
    return best


# ------------------------------ fused kernel --------------------------------
def _trans_encoder_kernel(x_ref, pe_ref,
                          w_in_ref, b_in_ref, w_out_ref, b_out_ref,
                          ln1_g_ref, ln1_b_ref,
                          w1_ref, b1_ref, w2_ref, b2_ref,
                          ln2_g_ref, ln2_b_ref,
                          lnf_g_ref, lnf_b_ref,
                          o_ref, *, n_head, num_layers, tb, seq):
    D = x_ref.shape[-1]
    hd = D // n_head
    scale = 1.0 / math.sqrt(hd)
    rows = tb * seq

    # (tb*seq, D) rows = tb whole batch elements; add positional encoding.
    x3 = x_ref[...].reshape(tb, seq, D).astype(jnp.float32)
    x = (x3 + pe_ref[...].astype(jnp.float32)).reshape(rows, D)

    for l in range(num_layers):                    # static unroll (num_layers small)
        # ---------------- multi-head self-attention -------------------------
        qkv = jnp.dot(x, w_in_ref[l], preferred_element_type=jnp.float32) + b_in_ref[l]
        q = qkv[:, 0 * D:1 * D] * scale
        k = qkv[:, 1 * D:2 * D]
        v = qkv[:, 2 * D:3 * D]
        w_out = w_out_ref[l]                       # (D, D)

        attn = None
        for h in range(n_head):                    # static head unroll
            qh = q[:, h * hd:(h + 1) * hd].reshape(tb, seq, hd)
            kh = k[:, h * hd:(h + 1) * hd].reshape(tb, seq, hd)
            vh = v[:, h * hd:(h + 1) * hd].reshape(tb, seq, hd)
            # scores: contract head dim, batch over the tile (no transpose copy)
            s = lax.dot_general(qh, kh, (((2,), (2,)), ((0,), (0,))),
                                preferred_element_type=jnp.float32)   # (tb, S, S)
            s = s - jnp.max(s, axis=-1, keepdims=True)
            p = jnp.exp(s)
            p = p * pl.reciprocal(jnp.sum(p, axis=-1, keepdims=True), approx=True)
            ctx = lax.dot_general(p, vh, (((2,), (1,)), ((0,), (0,))),
                                  preferred_element_type=jnp.float32)  # (tb, S, hd)
            # head-wise output projection (== concat-then-matmul, no concat needed)
            part = jnp.dot(ctx.reshape(rows, hd), w_out[h * hd:(h + 1) * hd, :],
                           preferred_element_type=jnp.float32)         # (rows, D)
            attn = part if attn is None else attn + part
        attn = attn + b_out_ref[l]
        x = _layer_norm(x + attn, ln1_g_ref[l], ln1_b_ref[l])

        # ---------------- feed-forward (relu) -------------------------------
        h1 = jnp.maximum(
            jnp.dot(x, w1_ref[l], preferred_element_type=jnp.float32) + b1_ref[l], 0.0)
        ff = jnp.dot(h1, w2_ref[l], preferred_element_type=jnp.float32) + b2_ref[l]
        x = _layer_norm(x + ff, ln2_g_ref[l], ln2_b_ref[l])

    # final encoder LayerNorm
    o_ref[...] = _layer_norm(x, lnf_g_ref[...], lnf_b_ref[...]).astype(o_ref.dtype)


# --------------------------------- module -----------------------------------
class TransEncoder:
    """JAX/Pallas port of the PyTorch TransEncoder (inference forward)."""

    def __init__(self, d_model, n_head, dim_ff, dropout=0.0, num_layers=1,
                 num_frames=64, param_key=None):
        assert d_model % n_head == 0
        self.d_model, self.n_head = d_model, n_head
        self.dim_ff, self.num_layers = dim_ff, num_layers
        # TODO(synk): dropout (p=0.1 pos-enc, `dropout` in the layer) is eval-mode
        # identity here; stochastic training-mode dropout is not implemented.

        # sinusoidal positional-encoding table, identical to PositionalEncoding
        pos = np.arange(num_frames, dtype=np.float32)[:, None]
        div = np.exp(np.arange(0, d_model, 2, dtype=np.float32)
                     * (-math.log(10000.0) / d_model))
        pe = np.zeros((num_frames, d_model), np.float32)
        pe[:, 0::2] = np.sin(pos * div)
        pe[:, 1::2] = np.cos(pos * div)
        self.pe = jnp.asarray(pe)                                    # (max_len, D)

        key = jax.random.PRNGKey(1) if param_key is None else param_key
        ks = jax.random.split(key, 12)
        L, D, FF = num_layers, d_model, dim_ff

        def w_init(k, shape, fan_in):
            return jax.random.normal(k, shape, jnp.float32) / math.sqrt(fan_in)

        # weights stored pre-transposed: y = x @ W + b   (fan_in, fan_out)
        self.w_in = w_init(ks[0], (L, D, 3 * D), D)
        self.b_in = 0.1 * jax.random.normal(ks[1], (L, 1, 3 * D), jnp.float32)
        self.w_out = w_init(ks[2], (L, D, D), D)
        self.b_out = 0.1 * jax.random.normal(ks[3], (L, 1, D), jnp.float32)
        self.w1 = w_init(ks[4], (L, D, FF), D)
        self.b1 = 0.1 * jax.random.normal(ks[5], (L, 1, FF), jnp.float32)
        self.w2 = w_init(ks[6], (L, FF, D), FF)
        self.b2 = 0.1 * jax.random.normal(ks[7], (L, 1, D), jnp.float32)
        self.ln1_g = 1.0 + 0.1 * jax.random.normal(ks[8], (L, 1, D), jnp.float32)
        self.ln1_b = 0.1 * jax.random.normal(ks[9], (L, 1, D), jnp.float32)
        self.ln2_g = 1.0 + 0.1 * jax.random.normal(ks[10], (L, 1, D), jnp.float32)
        self.ln2_b = 0.1 * jax.random.normal(ks[11], (L, 1, D), jnp.float32)
        self.lnf_g = jnp.ones((1, D), jnp.float32)
        self.lnf_b = jnp.zeros((1, D), jnp.float32)

    def _params(self):
        return (self.w_in, self.b_in, self.w_out, self.b_out,
                self.ln1_g, self.ln1_b,
                self.w1, self.b1, self.w2, self.b2,
                self.ln2_g, self.ln2_b,
                self.lnf_g, self.lnf_b)

    def __call__(self, src):
        S, B, D = src.shape
        assert D == self.d_model
        x2 = jnp.transpose(src, (1, 0, 2)).reshape(B * S, D)         # (B*S, D)
        pe = self.pe[:S]                                             # (S, D)
        params = self._params()

        tb = _pick_batch_tile(B, S)
        rows = tb * S
        grid = (B // tb,)

        def full(a):
            nd = a.ndim
            return pl.BlockSpec(a.shape, lambda i, _nd=nd: (0,) * _nd)

        kern = functools.partial(_trans_encoder_kernel,
                                 n_head=self.n_head, num_layers=self.num_layers,
                                 tb=tb, seq=S)
        out = pl.pallas_call(
            kern,
            out_shape=jax.ShapeDtypeStruct((B * S, D), src.dtype),
            grid=grid,
            in_specs=[pl.BlockSpec((rows, D), lambda i: (i, 0)),
                      full(pe)] + [full(p) for p in params],
            out_specs=pl.BlockSpec((rows, D), lambda i: (i, 0)),
            compiler_params=pltpu.CompilerParams(
                # batch-tile iterations are independent -> shardable on v7x's 2 TCs
                dimension_semantics=("parallel",)),
        )(x2, pe, *params)
        return jnp.transpose(out.reshape(B, S, D), (1, 0, 2))        # (S, B, D)

    # ------- pure-JAX (XLA) reference with identical math, for validation ----
    def reference(self, src):
        S, B, D = src.shape
        H, hd = self.n_head, D // self.n_head
        x = jnp.transpose(src, (1, 0, 2)) + self.pe[:S][None]        # (B, S, D)

        def ln(y, g, b):
            mu = y.mean(-1, keepdims=True)
            c = y - mu
            var = (c * c).mean(-1, keepdims=True)
            return c / jnp.sqrt(var + 1e-5) * g + b

        for l in range(self.num_layers):
            qkv = x @ self.w_in[l] + self.b_in[l]
            q = qkv[..., :D] / math.sqrt(hd)
            k = qkv[..., D:2 * D]
            v = qkv[..., 2 * D:]
            q = q.reshape(B, S, H, hd).transpose(0, 2, 1, 3)
            k = k.reshape(B, S, H, hd).transpose(0, 2, 1, 3)
            v = v.reshape(B, S, H, hd).transpose(0, 2, 1, 3)
            s = jnp.einsum('bhqd,bhkd->bhqk', q, k)
            p = jax.nn.softmax(s, axis=-1)
            ctx = jnp.einsum('bhqk,bhkd->bhqd', p, v)
            ctx = ctx.transpose(0, 2, 1, 3).reshape(B, S, D)
            attn = ctx @ self.w_out[l] + self.b_out[l]
            x = ln(x + attn, self.ln1_g[l], self.ln1_b[l])
            h1 = jax.nn.relu(x @ self.w1[l] + self.b1[l])
            ff = h1 @ self.w2[l] + self.b2[l]
            x = ln(x + ff, self.ln2_g[l], self.ln2_b[l])
        x = ln(x, self.lnf_g, self.lnf_b)
        return jnp.transpose(x, (1, 0, 2))


# ----------------------------------- main ------------------------------------
if __name__ == "__main__":
    S, B = 8, 2                         # seq, batch
    d_model, n_head, dim_ff = 32, 4, 64
    num_frames = 64

    key = jax.random.PRNGKey(0)
    k_src, k_par = jax.random.split(key)
    src = jax.random.normal(k_src, (S, B, d_model), dtype=jnp.float32)

    model = TransEncoder(d_model, n_head, dim_ff, dropout=0.0,
                         num_layers=1, num_frames=num_frames, param_key=k_par)

    out = jax.block_until_ready(model(src))
    ref = jax.block_until_ready(model.reference(src))

    assert out.shape == (S, B, d_model)
    err = float(np.max(np.abs(np.asarray(out) - np.asarray(ref))))
    assert np.allclose(np.asarray(out), np.asarray(ref), rtol=2e-2, atol=2e-2), err
    print("KERNEL_OK")
</pallas_src>

<mosaic_0001>
module attributes {stable_mosaic.version = 11 : i64} {
  func.func @_trans_encoder_kernel(%arg0: i32, %arg1: memref<16x32xf32, #tpu.memory_space<vmem>>, %arg2: memref<8x32xf32, #tpu.memory_space<vmem>>, %arg3: memref<1x32x96xf32, #tpu.memory_space<vmem>>, %arg4: memref<1x1x96xf32, #tpu.memory_space<vmem>>, %arg5: memref<1x32x32xf32, #tpu.memory_space<vmem>>, %arg6: memref<1x1x32xf32, #tpu.memory_space<vmem>>, %arg7: memref<1x1x32xf32, #tpu.memory_space<vmem>>, %arg8: memref<1x1x32xf32, #tpu.memory_space<vmem>>, %arg9: memref<1x32x64xf32, #tpu.memory_space<vmem>>, %arg10: memref<1x1x64xf32, #tpu.memory_space<vmem>>, %arg11: memref<1x64x32xf32, #tpu.memory_space<vmem>>, %arg12: memref<1x1x32xf32, #tpu.memory_space<vmem>>, %arg13: memref<1x1x32xf32, #tpu.memory_space<vmem>>, %arg14: memref<1x1x32xf32, #tpu.memory_space<vmem>>, %arg15: memref<1x32xf32, #tpu.memory_space<vmem>>, %arg16: memref<1x32xf32, #tpu.memory_space<vmem>>, %arg17: memref<16x32xf32, #tpu.memory_space<vmem>>) attributes {dimension_semantics = [#tpu.dimension_semantics<parallel>], iteration_bounds = array<i64: 1>, scalar_prefetch = 0 : i64, scratch_operands = 0 : i64, tpu.core_type = #tpu.core_type<tc>, window_params = [{transform_indices = @transform_0, window_bounds = array<i64: 16, 32>}, {pipeline_mode = #tpu.pipeline_mode<synchronous>, transform_indices = @transform_1, window_bounds = array<i64: 8, 32>}, {pipeline_mode = #tpu.pipeline_mode<synchronous>, transform_indices = @transform_2, window_bounds = array<i64: 1, 32, 96>}, {pipeline_mode = #tpu.pipeline_mode<synchronous>, transform_indices = @transform_3, window_bounds = array<i64: 1, 1, 96>}, {pipeline_mode = #tpu.pipeline_mode<synchronous>, transform_indices = @transform_4, window_bounds = array<i64: 1, 32, 32>}, {pipeline_mode = #tpu.pipeline_mode<synchronous>, transform_indices = @transform_5, window_bounds = array<i64: 1, 1, 32>}, {pipeline_mode = #tpu.pipeline_mode<synchronous>, transform_indices = @transform_6, window_bounds = array<i64: 1, 1, 32>}, {pipeline_mode = #tpu.pipeline_mode<synchronous>, transform_indices = @transform_7, window_bounds = array<i64: 1, 1, 32>}, {pipeline_mode = #tpu.pipeline_mode<synchronous>, transform_indices = @transform_8, window_bounds = array<i64: 1, 32, 64>}, {pipeline_mode = #tpu.pipeline_mode<synchronous>, transform_indices = @transform_9, window_bounds = array<i64: 1, 1, 64>}, {pipeline_mode = #tpu.pipeline_mode<synchronous>, transform_indices = @transform_10, window_bounds = array<i64: 1, 64, 32>}, {pipeline_mode = #tpu.pipeline_mode<synchronous>, transform_indices = @transform_11, window_bounds = array<i64: 1, 1, 32>}, {pipeline_mode = #tpu.pipeline_mode<synchronous>, transform_indices = @transform_12, window_bounds = array<i64: 1, 1, 32>}, {pipeline_mode = #tpu.pipeline_mode<synchronous>, transform_indices = @transform_13, window_bounds = array<i64: 1, 1, 32>}, {pipeline_mode = #tpu.pipeline_mode<synchronous>, transform_indices = @transform_14, window_bounds = array<i64: 1, 32>}, {pipeline_mode = #tpu.pipeline_mode<synchronous>, transform_indices = @transform_15, window_bounds = array<i64: 1, 32>}, {transform_indices = @transform_16, window_bounds = array<i64: 16, 32>}]} {
    %c0 = arith.constant 0 : index
    %c0_0 = arith.constant 0 : index
    %0 = vector.load %arg1[%c0, %c0_0] : memref<16x32xf32, #tpu.memory_space<vmem>>, vector<16x32xf32>
    %1 = vector.shape_cast %0 : vector<16x32xf32> to vector<2x8x32xf32>
    %c0_1 = arith.constant 0 : index
    %c0_2 = arith.constant 0 : index
    %2 = vector.load %arg2[%c0_1, %c0_2] : memref<8x32xf32, #tpu.memory_space<vmem>>, vector<8x32xf32>
    %3 = vector.shape_cast %2 : vector<8x32xf32> to vector<1x8x32xf32>
    %4 = vector.broadcast %3 : vector<1x8x32xf32> to vector<2x8x32xf32>
    %5 = arith.addf %1, %4 : vector<2x8x32xf32>
    %6 = vector.shape_cast %5 : vector<2x8x32xf32> to vector<16x32xf32>
    %c0_3 = arith.constant 0 : index
    %c0_4 = arith.constant 0 : index
    %c0_5 = arith.constant 0 : index
    %7 = vector.load %arg3[%c0_3, %c0_4, %c0_5] : memref<1x32x96xf32, #tpu.memory_space<vmem>>, vector<1x32x96xf32>
    %8 = vector.shape_cast %7 : vector<1x32x96xf32> to vector<32x96xf32>
    %cst = arith.constant dense<0.000000e+00> : vector<16x96xf32>
    %9 = tpu.matmul %6, %8, %cst {dimension_numbers = #tpu.dot_dimension_numbers<[1], [0], [0], [1], [0, 0, 1, 1], [], []>} : vector<16x32xf32>, vector<32x96xf32>, vector<16x96xf32> -> vector<16x96xf32>
    %c0_6 = arith.constant 0 : index
    %c0_7 = arith.constant 0 : index
    %c0_8 = arith.constant 0 : index
    %10 = vector.load %arg4[%c0_6, %c0_7, %c0_8] : memref<1x1x96xf32, #tpu.memory_space<vmem>>, vector<1x1x96xf32>
    %11 = vector.shape_cast %10 : vector<1x1x96xf32> to vector<1x96xf32>
    %12 = vector.broadcast %11 : vector<1x96xf32> to vector<16x96xf32>
    %13 = arith.addf %9, %12 : vector<16x96xf32>
    %14 = vector.extract_strided_slice %13 {offsets = [0, 0], sizes = [16, 32], strides = [1, 1]} : vector<16x96xf32> to vector<16x32xf32>
    %cst_9 = arith.constant 0.353553385 : f32
    %15 = vector.broadcast %cst_9 : f32 to vector<16x32xf32>
    %16 = arith.mulf %14, %15 : vector<16x32xf32>
    %17 = vector.extract_strided_slice %13 {offsets = [0, 32], sizes = [16, 32], strides = [1, 1]} : vector<16x96xf32> to vector<16x32xf32>
    %18 = vector.extract_strided_slice %13 {offsets = [0, 64], sizes = [16, 32], strides = [1, 1]} : vector<16x96xf32> to vector<16x32xf32>
    %c0_10 = arith.constant 0 : index
    %c0_11 = arith.constant 0 : index
    %c0_12 = arith.constant 0 : index
    %19 = vector.load %arg5[%c0_10, %c0_11, %c0_12] : memref<1x32x32xf32, #tpu.memory_space<vmem>>, vector<1x32x32xf32>
    %20 = vector.shape_cast %19 : vector<1x32x32xf32> to vector<32x32xf32>
    %21 = vector.extract_strided_slice %16 {offsets = [0, 0], sizes = [16, 8], strides = [1, 1]} : vector<16x32xf32> to vector<16x8xf32>
    %22 = vector.shape_cast %21 : vector<16x8xf32> to vector<2x8x8xf32>
    %23 = vector.extract_strided_slice %17 {offsets = [0, 0], sizes = [16, 8], strides = [1, 1]} : vector<16x32xf32> to vector<16x8xf32>
    %24 = vector.shape_cast %23 : vector<16x8xf32> to vector<2x8x8xf32>
    %25 = vector.extract_strided_slice %18 {offsets = [0, 0], sizes = [16, 8], strides = [1, 1]} : vector<16x32xf32> to vector<16x8xf32>
    %26 = vector.shape_cast %25 : vector<16x8xf32> to vector<2x8x8xf32>
    %cst_13 = arith.constant dense<0.000000e+00> : vector<2x8x8xf32>
    %27 = tpu.matmul %22, %24, %cst_13 {dimension_numbers = #tpu.dot_dimension_numbers<[2], [2], [1], [1], [0, 0, 0, 1, 1, 1], [0], [0]>} : vector<2x8x8xf32>, vector<2x8x8xf32>, vector<2x8x8xf32> -> vector<2x8x8xf32>
    %cst_14 = arith.constant dense<0xFF800000> : vector<2x8xf32>
    %28 = vector.multi_reduction <maximumf>, %27, %cst_14 [2] : vector<2x8x8xf32> to vector<2x8xf32>
    %29 = vector.shape_cast %28 : vector<2x8xf32> to vector<2x8x1xf32>
    %30 = vector.broadcast %29 : vector<2x8x1xf32> to vector<2x8x8xf32>
    %31 = arith.subf %27, %30 : vector<2x8x8xf32>
    %32 = math.exp %31 : vector<2x8x8xf32>
    %cst_15 = arith.constant dense<0.000000e+00> : vector<2x8xf32>
    %33 = vector.multi_reduction <add>, %32, %cst_15 [2] : vector<2x8x8xf32> to vector<2x8xf32>
    %34 = vector.shape_cast %33 : vector<2x8xf32> to vector<2x8x1xf32>
    %35 = tpu.reciprocal %34 {approx = true} : vector<2x8x1xf32> -> vector<2x8x1xf32>
    %36 = vector.broadcast %35 : vector<2x8x1xf32> to vector<2x8x8xf32>
    %37 = arith.mulf %32, %36 : vector<2x8x8xf32>
    %cst_16 = arith.constant dense<0.000000e+00> : vector<2x8x8xf32>
    %38 = tpu.matmul %37, %26, %cst_16 {dimension_numbers = #tpu.dot_dimension_numbers<[2], [1], [1], [2], [0, 0, 0, 1, 1, 2], [0], [0]>} : vector<2x8x8xf32>, vector<2x8x8xf32>, vector<2x8x8xf32> -> vector<2x8x8xf32>
    %39 = vector.shape_cast %38 : vector<2x8x8xf32> to vector<16x8xf32>
    %40 = vector.extract_strided_slice %20 {offsets = [0, 0], sizes = [8, 32], strides = [1, 1]} : vector<32x32xf32> to vector<8x32xf32>
    %cst_17 = arith.constant dense<0.000000e+00> : vector<16x32xf32>
    %41 = tpu.matmul %39, %40, %cst_17 {dimension_numbers = #tpu.dot_dimension_numbers<[1], [0], [0], [1], [0, 0, 1, 1], [], []>} : vector<16x8xf32>, vector<8x32xf32>, vector<16x32xf32> -> vector<16x32xf32>
    %42 = vector.extract_strided_slice %16 {offsets = [0, 8], sizes = [16, 8], strides = [1, 1]} : vector<16x32xf32> to vector<16x8xf32>
    %43 = vector.shape_cast %42 : vector<16x8xf32> to vector<2x8x8xf32>
    %44 = vector.extract_strided_slice %17 {offsets = [0, 8], sizes = [16, 8], strides = [1, 1]} : vector<16x32xf32> to vector<16x8xf32>
    %45 = vector.shape_cast %44 : vector<16x8xf32> to vector<2x8x8xf32>
    %46 = vector.extract_strided_slice %18 {offsets = [0, 8], sizes = [16, 8], strides = [1, 1]} : vector<16x32xf32> to vector<16x8xf32>
    %47 = vector.shape_cast %46 : vector<16x8xf32> to vector<2x8x8xf32>
    %cst_18 = arith.constant dense<0.000000e+00> : vector<2x8x8xf32>
    %48 = tpu.matmul %43, %45, %cst_18 {dimension_numbers = #tpu.dot_dimension_numbers<[2], [2], [1], [1], [0, 0, 0, 1, 1, 1], [0], [0]>} : vector<2x8x8xf32>, vector<2x8x8xf32>, vector<2x8x8xf32> -> vector<2x8x8xf32>
    %cst_19 = arith.constant dense<0xFF800000> : vector<2x8xf32>
    %49 = vector.multi_reduction <maximumf>, %48, %cst_19 [2] : vector<2x8x8xf32> to vector<2x8xf32>
    %50 = vector.shape_cast %49 : vector<2x8xf32> to vector<2x8x1xf32>
    %51 = vector.broadcast %50 : vector<2x8x1xf32> to vector<2x8x8xf32>
    %52 = arith.subf %48, %51 : vector<2x8x8xf32>
    %53 = math.exp %52 : vector<2x8x8xf32>
    %cst_20 = arith.constant dense<0.000000e+00> : vector<2x8xf32>
    %54 = vector.multi_reduction <add>, %53, %cst_20 [2] : vector<2x8x8xf32> to vector<2x8xf32>
    %55 = vector.shape_cast %54 : vector<2x8xf32> to vector<2x8x1xf32>
    %56 = tpu.reciprocal %55 {approx = true} : vector<2x8x1xf32> -> vector<2x8x1xf32>
    %57 = vector.broadcast %56 : vector<2x8x1xf32> to vector<2x8x8xf32>
    %58 = arith.mulf %53, %57 : vector<2x8x8xf32>
    %cst_21 = arith.constant dense<0.000000e+00> : vector<2x8x8xf32>
    %59 = tpu.matmul %58, %47, %cst_21 {dimension_numbers = #tpu.dot_dimension_numbers<[2], [1], [1], [2], [0, 0, 0, 1, 1, 2], [0], [0]>} : vector<2x8x8xf32>, vector<2x8x8xf32>, vector<2x8x8xf32> -> vector<2x8x8xf32>
    %60 = vector.shape_cast %59 : vector<2x8x8xf32> to vector<16x8xf32>
    %61 = vector.extract_strided_slice %20 {offsets = [8, 0], sizes = [8, 32], strides = [1, 1]} : vector<32x32xf32> to vector<8x32xf32>
    %cst_22 = arith.constant dense<0.000000e+00> : vector<16x32xf32>
    %62 = tpu.matmul %60, %61, %cst_22 {dimension_numbers = #tpu.dot_dimension_numbers<[1], [0], [0], [1], [0, 0, 1, 1], [], []>} : vector<16x8xf32>, vector<8x32xf32>, vector<16x32xf32> -> vector<16x32xf32>
    %63 = arith.addf %41, %62 : vector<16x32xf32>
    %64 = vector.extract_strided_slice %16 {offsets = [0, 16], sizes = [16, 8], strides = [1, 1]} : vector<16x32xf32> to vector<16x8xf32>
    %65 = vector.shape_cast %64 : vector<16x8xf32> to vector<2x8x8xf32>
    %66 = vector.extract_strided_slice %17 {offsets = [0, 16], sizes = [16, 8], strides = [1, 1]} : vector<16x32xf32> to vector<16x8xf32>
    %67 = vector.shape_cast %66 : vector<16x8xf32> to vector<2x8x8xf32>
    %68 = vector.extract_strided_slice %18 {offsets = [0, 16], sizes = [16, 8], strides = [1, 1]} : vector<16x32xf32> to vector<16x8xf32>
    %69 = vector.shape_cast %68 : vector<16x8xf32> to vector<2x8x8xf32>
    %cst_23 = arith.constant dense<0.000000e+00> : vector<2x8x8xf32>
    %70 = tpu.matmul %65, %67, %cst_23 {dimension_numbers = #tpu.dot_dimension_numbers<[2], [2], [1], [1], [0, 0, 0, 1, 1, 1], [0], [0]>} : vector<2x8x8xf32>, vector<2x8x8xf32>, vector<2x8x8xf32> -> vector<2x8x8xf32>
    %cst_24 = arith.constant dense<0xFF800000> : vector<2x8xf32>
    %71 = vector.multi_reduction <maximumf>, %70, %cst_24 [2] : vector<2x8x8xf32> to vector<2x8xf32>
    %72 = vector.shape_cast %71 : vector<2x8xf32> to vector<2x8x1xf32>
    %73 = vector.broadcast %72 : vector<2x8x1xf32> to vector<2x8x8xf32>
    %74 = arith.subf %70, %73 : vector<2x8x8xf32>
    %75 = math.exp %74 : vector<2x8x8xf32>
    %cst_25 = arith.constant dense<0.000000e+00> : vector<2x8xf32>
    %76 = vector.multi_reduction <add>, %75, %cst_25 [2] : vector<2x8x8xf32> to vector<2x8xf32>
    %77 = vector.shape_cast %76 : vector<2x8xf32> to vector<2x8x1xf32>
    %78 = tpu.reciprocal %77 {approx = true} : vector<2x8x1xf32> -> vector<2x8x1xf32>
    %79 = vector.broadcast %78 : vector<2x8x1xf32> to vector<2x8x8xf32>
    %80 = arith.mulf %75, %79 : vector<2x8x8xf32>
    %cst_26 = arith.constant dense<0.000000e+00> : vector<2x8x8xf32>
    %81 = tpu.matmul %80, %69, %cst_26 {dimension_numbers = #tpu.dot_dimension_numbers<[2], [1], [1], [2], [0, 0, 0, 1, 1, 2], [0], [0]>} : vector<2x8x8xf32>, vector<2x8x8xf32>, vector<2x8x8xf32> -> vector<2x8x8xf32>
    %82 = vector.shape_cast %81 : vector<2x8x8xf32> to vector<16x8xf32>
    %83 = vector.extract_strided_slice %20 {offsets = [16, 0], sizes = [8, 32], strides = [1, 1]} : vector<32x32xf32> to vector<8x32xf32>
    %cst_27 = arith.constant dense<0.000000e+00> : vector<16x32xf32>
    %84 = tpu.matmul %82, %83, %cst_27 {dimension_numbers = #tpu.dot_dimension_numbers<[1], [0], [0], [1], [0, 0, 1, 1], [], []>} : vector<16x8xf32>, vector<8x32xf32>, vector<16x32xf32> -> vector<16x32xf32>
    %85 = arith.addf %63, %84 : vector<16x32xf32>
    %86 = vector.extract_strided_slice %16 {offsets = [0, 24], sizes = [16, 8], strides = [1, 1]} : vector<16x32xf32> to vector<16x8xf32>
    %87 = vector.shape_cast %86 : vector<16x8xf32> to vector<2x8x8xf32>
    %88 = vector.extract_strided_slice %17 {offsets = [0, 24], sizes = [16, 8], strides = [1, 1]} : vector<16x32xf32> to vector<16x8xf32>
    %89 = vector.shape_cast %88 : vector<16x8xf32> to vector<2x8x8xf32>
    %90 = vector.extract_strided_slice %18 {offsets = [0, 24], sizes = [16, 8], strides = [1, 1]} : vector<16x32xf32> to vector<16x8xf32>
    %91 = vector.shape_cast %90 : vector<16x8xf32> to vector<2x8x8xf32>
    %cst_28 = arith.constant dense<0.000000e+00> : vector<2x8x8xf32>
    %92 = tpu.matmul %87, %89, %cst_28 {dimension_numbers = #tpu.dot_dimension_numbers<[2], [2], [1], [1], [0, 0, 0, 1, 1, 1], [0], [0]>} : vector<2x8x8xf32>, vector<2x8x8xf32>, vector<2x8x8xf32> -> vector<2x8x8xf32>
    %cst_29 = arith.constant dense<0xFF800000> : vector<2x8xf32>
    %93 = vector.multi_reduction <maximumf>, %92, %cst_29 [2] : vector<2x8x8xf32> to vector<2x8xf32>
    %94 = vector.shape_cast %93 : vector<2x8xf32> to vector<2x8x1xf32>
    %95 = vector.broadcast %94 : vector<2x8x1xf32> to vector<2x8x8xf32>
    %96 = arith.subf %92, %95 : vector<2x8x8xf32>
    %97 = math.exp %96 : vector<2x8x8xf32>
    %cst_30 = arith.constant dense<0.000000e+00> : vector<2x8xf32>
    %98 = vector.multi_reduction <add>, %97, %cst_30 [2] : vector<2x8x8xf32> to vector<2x8xf32>
    %99 = vector.shape_cast %98 : vector<2x8xf32> to vector<2x8x1xf32>
    %100 = tpu.reciprocal %99 {approx = true} : vector<2x8x1xf32> -> vector<2x8x1xf32>
    %101 = vector.broadcast %100 : vector<2x8x1xf32> to vector<2x8x8xf32>
    %102 = arith.mulf %97, %101 : vector<2x8x8xf32>
    %cst_31 = arith.constant dense<0.000000e+00> : vector<2x8x8xf32>
    %103 = tpu.matmul %102, %91, %cst_31 {dimension_numbers = #tpu.dot_dimension_numbers<[2], [1], [1], [2], [0, 0, 0, 1, 1, 2], [0], [0]>} : vector<2x8x8xf32>, vector<2x8x8xf32>, vector<2x8x8xf32> -> vector<2x8x8xf32>
    %104 = vector.shape_cast %103 : vector<2x8x8xf32> to vector<16x8xf32>
    %105 = vector.extract_strided_slice %20 {offsets = [24, 0], sizes = [8, 32], strides = [1, 1]} : vector<32x32xf32> to vector<8x32xf32>
    %cst_32 = arith.constant dense<0.000000e+00> : vector<16x32xf32>
    %106 = tpu.matmul %104, %105, %cst_32 {dimension_numbers = #tpu.dot_dimension_numbers<[1], [0], [0], [1], [0, 0, 1, 1], [], []>} : vector<16x8xf32>, vector<8x32xf32>, vector<16x32xf32> -> vector<16x32xf32>
    %107 = arith.addf %85, %106 : vector<16x32xf32>
    %c0_33 = arith.constant 0 : index
    %c0_34 = arith.constant 0 : index
    %c0_35 = arith.constant 0 : index
    %108 = vector.load %arg6[%c0_33, %c0_34, %c0_35] : memref<1x1x32xf32, #tpu.memory_space<vmem>>, vector<1x1x32xf32>
    %109 = vector.shape_cast %108 : vector<1x1x32xf32> to vector<1x32xf32>
    %110 = vector.broadcast %109 : vector<1x32xf32> to vector<16x32xf32>
    %111 = arith.addf %107, %110 : vector<16x32xf32>
    %112 = arith.addf %6, %111 : vector<16x32xf32>
    %c0_36 = arith.constant 0 : index
    %c0_37 = arith.constant 0 : index
    %c0_38 = arith.constant 0 : index
    %113 = vector.load %arg7[%c0_36, %c0_37, %c0_38] : memref<1x1x32xf32, #tpu.memory_space<vmem>>, vector<1x1x32xf32>
    %114 = vector.shape_cast %113 : vector<1x1x32xf32> to vector<1x32xf32>
    %c0_39 = arith.constant 0 : index
    %c0_40 = arith.constant 0 : index
    %c0_41 = arith.constant 0 : index
    %115 = vector.load %arg8[%c0_39, %c0_40, %c0_41] : memref<1x1x32xf32, #tpu.memory_space<vmem>>, vector<1x1x32xf32>
    %116 = vector.shape_cast %115 : vector<1x1x32xf32> to vector<1x32xf32>
    %cst_42 = arith.constant dense<0.000000e+00> : vector<16xf32>
    %117 = vector.multi_reduction <add>, %112, %cst_42 [1] : vector<16x32xf32> to vector<16xf32>
    %118 = vector.shape_cast %117 : vector<16xf32> to vector<16x1xf32>
    %cst_43 = arith.constant 3.200000e+01 : f32
    %119 = vector.broadcast %cst_43 : f32 to vector<16x1xf32>
    %120 = arith.divf %118, %119 : vector<16x1xf32>
    %121 = vector.broadcast %120 : vector<16x1xf32> to vector<16x32xf32>
    %122 = arith.subf %112, %121 : vector<16x32xf32>
    %123 = arith.mulf %122, %122 : vector<16x32xf32>
    %cst_44 = arith.constant dense<0.000000e+00> : vector<16xf32>
    %124 = vector.multi_reduction <add>, %123, %cst_44 [1] : vector<16x32xf32> to vector<16xf32>
    %125 = vector.shape_cast %124 : vector<16xf32> to vector<16x1xf32>
    %cst_45 = arith.constant 3.200000e+01 : f32
    %126 = vector.broadcast %cst_45 : f32 to vector<16x1xf32>
    %127 = arith.divf %125, %126 : vector<16x1xf32>
    %cst_46 = arith.constant 9.99999974E-6 : f32
    %128 = vector.broadcast %cst_46 : f32 to vector<16x1xf32>
    %129 = arith.addf %127, %128 : vector<16x1xf32>
    %130 = math.rsqrt %129 : vector<16x1xf32>
    %131 = vector.broadcast %130 : vector<16x1xf32> to vector<16x32xf32>
    %132 = arith.mulf %122, %131 : vector<16x32xf32>
    %133 = vector.broadcast %114 : vector<1x32xf32> to vector<16x32xf32>
    %134 = arith.mulf %132, %133 : vector<16x32xf32>
    %135 = vector.broadcast %116 : vector<1x32xf32> to vector<16x32xf32>
    %136 = arith.addf %134, %135 : vector<16x32xf32>
    %c0_47 = arith.constant 0 : index
    %c0_48 = arith.constant 0 : index
    %c0_49 = arith.constant 0 : index
    %137 = vector.load %arg9[%c0_47, %c0_48, %c0_49] : memref<1x32x64xf32, #tpu.memory_space<vmem>>, vector<1x32x64xf32>
    %138 = vector.shape_cast %137 : vector<1x32x64xf32> to vector<32x64xf32>
    %cst_50 = arith.constant dense<0.000000e+00> : vector<16x64xf32>
    %139 = tpu.matmul %136, %138, %cst_50 {dimension_numbers = #tpu.dot_dimension_numbers<[1], [0], [0], [1], [0, 0, 1, 1], [], []>} : vector<16x32xf32>, vector<32x64xf32>, vector<16x64xf32> -> vector<16x64xf32>
    %c0_51 = arith.constant 0 : index
    %c0_52 = arith.constant 0 : index
    %c0_53 = arith.constant 0 : index
    %140 = vector.load %arg10[%c0_51, %c0_52, %c0_53] : memref<1x1x64xf32, #tpu.memory_space<vmem>>, vector<1x1x64xf32>
    %141 = vector.shape_cast %140 : vector<1x1x64xf32> to vector<1x64xf32>
    %142 = vector.broadcast %141 : vector<1x64xf32> to vector<16x64xf32>
    %143 = arith.addf %139, %142 : vector<16x64xf32>
    %cst_54 = arith.constant 0.000000e+00 : f32
    %144 = vector.broadcast %cst_54 : f32 to vector<16x64xf32>
    %145 = arith.maximumf %143, %144 : vector<16x64xf32>
    %c0_55 = arith.constant 0 : index
    %c0_56 = arith.constant 0 : index
    %c0_57 = arith.constant 0 : index
    %146 = vector.load %arg11[%c0_55, %c0_56, %c0_57] : memref<1x64x32xf32, #tpu.memory_space<vmem>>, vector<1x64x32xf32>
    %147 = vector.shape_cast %146 : vector<1x64x32xf32> to vector<64x32xf32>
    %cst_58 = arith.constant dense<0.000000e+00> : vector<16x32xf32>
    %148 = tpu.matmul %145, %147, %cst_58 {dimension_numbers = #tpu.dot_dimension_numbers<[1], [0], [0], [1], [0, 0, 1, 1], [], []>} : vector<16x64xf32>, vector<64x32xf32>, vector<16x32xf32> -> vector<16x32xf32>
    %c0_59 = arith.constant 0 : index
    %c0_60 = arith.constant 0 : index
    %c0_61 = arith.constant 0 : index
    %149 = vector.load %arg12[%c0_59, %c0_60, %c0_61] : memref<1x1x32xf32, #tpu.memory_space<vmem>>, vector<1x1x32xf32>
    %150 = vector.shape_cast %149 : vector<1x1x32xf32> to vector<1x32xf32>
    %151 = vector.broadcast %150 : vector<1x32xf32> to vector<16x32xf32>
    %152 = arith.addf %148, %151 : vector<16x32xf32>
    %153 = arith.addf %136, %152 : vector<16x32xf32>
    %c0_62 = arith.constant 0 : index
    %c0_63 = arith.constant 0 : index
    %c0_64 = arith.constant 0 : index
    %154 = vector.load %arg13[%c0_62, %c0_63, %c0_64] : memref<1x1x32xf32, #tpu.memory_space<vmem>>, vector<1x1x32xf32>
    %155 = vector.shape_cast %154 : vector<1x1x32xf32> to vector<1x32xf32>
    %c0_65 = arith.constant 0 : index
    %c0_66 = arith.constant 0 : index
    %c0_67 = arith.constant 0 : index
    %156 = vector.load %arg14[%c0_65, %c0_66, %c0_67] : memref<1x1x32xf32, #tpu.memory_space<vmem>>, vector<1x1x32xf32>
    %157 = vector.shape_cast %156 : vector<1x1x32xf32> to vector<1x32xf32>
    %cst_68 = arith.constant dense<0.000000e+00> : vector<16xf32>
    %158 = vector.multi_reduction <add>, %153, %cst_68 [1] : vector<16x32xf32> to vector<16xf32>
    %159 = vector.shape_cast %158 : vector<16xf32> to vector<16x1xf32>
    %cst_69 = arith.constant 3.200000e+01 : f32
    %160 = vector.broadcast %cst_69 : f32 to vector<16x1xf32>
    %161 = arith.divf %159, %160 : vector<16x1xf32>
    %162 = vector.broadcast %161 : vector<16x1xf32> to vector<16x32xf32>
    %163 = arith.subf %153, %162 : vector<16x32xf32>
    %164 = arith.mulf %163, %163 : vector<16x32xf32>
    %cst_70 = arith.constant dense<0.000000e+00> : vector<16xf32>
    %165 = vector.multi_reduction <add>, %164, %cst_70 [1] : vector<16x32xf32> to vector<16xf32>
    %166 = vector.shape_cast %165 : vector<16xf32> to vector<16x1xf32>
    %cst_71 = arith.constant 3.200000e+01 : f32
    %167 = vector.broadcast %cst_71 : f32 to vector<16x1xf32>
    %168 = arith.divf %166, %167 : vector<16x1xf32>
    %cst_72 = arith.constant 9.99999974E-6 : f32
    %169 = vector.broadcast %cst_72 : f32 to vector<16x1xf32>
    %170 = arith.addf %168, %169 : vector<16x1xf32>
    %171 = math.rsqrt %170 : vector<16x1xf32>
    %172 = vector.broadcast %171 : vector<16x1xf32> to vector<16x32xf32>
    %173 = arith.mulf %163, %172 : vector<16x32xf32>
    %174 = vector.broadcast %155 : vector<1x32xf32> to vector<16x32xf32>
    %175 = arith.mulf %173, %174 : vector<16x32xf32>
    %176 = vector.broadcast %157 : vector<1x32xf32> to vector<16x32xf32>
    %177 = arith.addf %175, %176 : vector<16x32xf32>
    %c0_73 = arith.constant 0 : index
    %c0_74 = arith.constant 0 : index
    %178 = vector.load %arg15[%c0_73, %c0_74] : memref<1x32xf32, #tpu.memory_space<vmem>>, vector<1x32xf32>
    %c0_75 = arith.constant 0 : index
    %c0_76 = arith.constant 0 : index
    %179 = vector.load %arg16[%c0_75, %c0_76] : memref<1x32xf32, #tpu.memory_space<vmem>>, vector<1x32xf32>
    %cst_77 = arith.constant dense<0.000000e+00> : vector<16xf32>
    %180 = vector.multi_reduction <add>, %177, %cst_77 [1] : vector<16x32xf32> to vector<16xf32>
    %181 = vector.shape_cast %180 : vector<16xf32> to vector<16x1xf32>
    %cst_78 = arith.constant 3.200000e+01 : f32
    %182 = vector.broadcast %cst_78 : f32 to vector<16x1xf32>
    %183 = arith.divf %181, %182 : vector<16x1xf32>
    %184 = vector.broadcast %183 : vector<16x1xf32> to vector<16x32xf32>
    %185 = arith.subf %177, %184 : vector<16x32xf32>
    %186 = arith.mulf %185, %185 : vector<16x32xf32>
    %cst_79 = arith.constant dense<0.000000e+00> : vector<16xf32>
    %187 = vector.multi_reduction <add>, %186, %cst_79 [1] : vector<16x32xf32> to vector<16xf32>
    %188 = vector.shape_cast %187 : vector<16xf32> to vector<16x1xf32>
    %cst_80 = arith.constant 3.200000e+01 : f32
    %189 = vector.broadcast %cst_80 : f32 to vector<16x1xf32>
    %190 = arith.divf %188, %189 : vector<16x1xf32>
    %cst_81 = arith.constant 9.99999974E-6 : f32
    %191 = vector.broadcast %cst_81 : f32 to vector<16x1xf32>
    %192 = arith.addf %190, %191 : vector<16x1xf32>
    %193 = math.rsqrt %192 : vector<16x1xf32>
    %194 = vector.broadcast %193 : vector<16x1xf32> to vector<16x32xf32>
    %195 = arith.mulf %185, %194 : vector<16x32xf32>
    %196 = vector.broadcast %178 : vector<1x32xf32> to vector<16x32xf32>
    %197 = arith.mulf %195, %196 : vector<16x32xf32>
    %198 = vector.broadcast %179 : vector<1x32xf32> to vector<16x32xf32>
    %199 = arith.addf %197, %198 : vector<16x32xf32>
    %c0_82 = arith.constant 0 : index
    %c0_83 = arith.constant 0 : index
    %200 = vector.load %arg17[%c0_82, %c0_83] : memref<16x32xf32, #tpu.memory_space<vmem>>, vector<16x32xf32>
    tpu.vector_store %arg17[%c0_82, %c0_83], %199 {strides = array<i32>} : memref<16x32xf32, #tpu.memory_space<vmem>>, vector<16x32xf32>,
    return
  }
  func.func @transform_0(%arg0: i32) -> (i32, i32) {
    %c0_i32 = arith.constant 0 : i32
    %c0_i32_0 = arith.constant 0 : i32
    return %arg0, %c0_i32 : i32, i32
  }
  func.func @transform_1(%arg0: i32) -> (i32, i32) {
    %c0_i32 = arith.constant 0 : i32
    %c0_i32_0 = arith.constant 0 : i32
    %c0_i32_1 = arith.constant 0 : i32
    return %c0_i32, %c0_i32_0 : i32, i32
  }
  func.func @transform_2(%arg0: i32) -> (i32, i32, i32) {
    %c0_i32 = arith.constant 0 : i32
    %c0_i32_0 = arith.constant 0 : i32
    %c0_i32_1 = arith.constant 0 : i32
    %c0_i32_2 = arith.constant 0 : i32
    return %c0_i32, %c0_i32_0, %c0_i32_1 : i32, i32, i32
  }
  func.func @transform_3(%arg0: i32) -> (i32, i32, i32) {
    %c0_i32 = arith.constant 0 : i32
    %c0_i32_0 = arith.constant 0 : i32
    %c0_i32_1 = arith.constant 0 : i32
    %c0_i32_2 = arith.constant 0 : i32
    return %c0_i32, %c0_i32_0, %c0_i32_1 : i32, i32, i32
  }
  func.func @transform_4(%arg0: i32) -> (i32, i32, i32) {
    %c0_i32 = arith.constant 0 : i32
    %c0_i32_0 = arith.constant 0 : i32
    %c0_i32_1 = arith.constant 0 : i32
    %c0_i32_2 = arith.constant 0 : i32
    return %c0_i32, %c0_i32_0, %c0_i32_1 : i32, i32, i32
  }
  func.func @transform_5(%arg0: i32) -> (i32, i32, i32) {
    %c0_i32 = arith.constant 0 : i32
    %c0_i32_0 = arith.constant 0 : i32
    %c0_i32_1 = arith.constant 0 : i32
    %c0_i32_2 = arith.constant 0 : i32
    return %c0_i32, %c0_i32_0, %c0_i32_1 : i32, i32, i32
  }
  func.func @transform_6(%arg0: i32) -> (i32, i32, i32) {
    %c0_i32 = arith.constant 0 : i32
    %c0_i32_0 = arith.constant 0 : i32
    %c0_i32_1 = arith.constant 0 : i32
    %c0_i32_2 = arith.constant 0 : i32
    return %c0_i32, %c0_i32_0, %c0_i32_1 : i32, i32, i32
  }
  func.func @transform_7(%arg0: i32) -> (i32, i32, i32) {
    %c0_i32 = arith.constant 0 : i32
    %c0_i32_0 = arith.constant 0 : i32
    %c0_i32_1 = arith.constant 0 : i32
    %c0_i32_2 = arith.constant 0 : i32
    return %c0_i32, %c0_i32_0, %c0_i32_1 : i32, i32, i32
  }
  func.func @transform_8(%arg0: i32) -> (i32, i32, i32) {
    %c0_i32 = arith.constant 0 : i32
    %c0_i32_0 = arith.constant 0 : i32
    %c0_i32_1 = arith.constant 0 : i32
    %c0_i32_2 = arith.constant 0 : i32
    return %c0_i32, %c0_i32_0, %c0_i32_1 : i32, i32, i32
  }
  func.func @transform_9(%arg0: i32) -> (i32, i32, i32) {
    %c0_i32 = arith.constant 0 : i32
    %c0_i32_0 = arith.constant 0 : i32
    %c0_i32_1 = arith.constant 0 : i32
    %c0_i32_2 = arith.constant 0 : i32
    return %c0_i32, %c0_i32_0, %c0_i32_1 : i32, i32, i32
  }
  func.func @transform_10(%arg0: i32) -> (i32, i32, i32) {
    %c0_i32 = arith.constant 0 : i32
    %c0_i32_0 = arith.constant 0 : i32
    %c0_i32_1 = arith.constant 0 : i32
    %c0_i32_2 = arith.constant 0 : i32
    return %c0_i32, %c0_i32_0, %c0_i32_1 : i32, i32, i32
  }
  func.func @transform_11(%arg0: i32) -> (i32, i32, i32) {
    %c0_i32 = arith.constant 0 : i32
    %c0_i32_0 = arith.constant 0 : i32
    %c0_i32_1 = arith.constant 0 : i32
    %c0_i32_2 = arith.constant 0 : i32
    return %c0_i32, %c0_i32_0, %c0_i32_1 : i32, i32, i32
  }
  func.func @transform_12(%arg0: i32) -> (i32, i32, i32) {
    %c0_i32 = arith.constant 0 : i32
    %c0_i32_0 = arith.constant 0 : i32
    %c0_i32_1 = arith.constant 0 : i32
    %c0_i32_2 = arith.constant 0 : i32
    return %c0_i32, %c0_i32_0, %c0_i32_1 : i32, i32, i32
  }
  func.func @transform_13(%arg0: i32) -> (i32, i32, i32) {
    %c0_i32 = arith.constant 0 : i32
    %c0_i32_0 = arith.constant 0 : i32
    %c0_i32_1 = arith.constant 0 : i32
    %c0_i32_2 = arith.constant 0 : i32
    return %c0_i32, %c0_i32_0, %c0_i32_1 : i32, i32, i32
  }
  func.func @transform_14(%arg0: i32) -> (i32, i32) {
    %c0_i32 = arith.constant 0 : i32
    %c0_i32_0 = arith.constant 0 : i32
    %c0_i32_1 = arith.constant 0 : i32
    return %c0_i32, %c0_i32_0 : i32, i32
  }
  func.func @transform_15(%arg0: i32) -> (i32, i32) {
    %c0_i32 = arith.constant 0 : i32
    %c0_i32_0 = arith.constant 0 : i32
    %c0_i32_1 = arith.constant 0 : i32
    return %c0_i32, %c0_i32_0 : i32, i32
  }
  func.func @transform_16(%arg0: i32) -> (i32, i32) {
    %c0_i32 = arith.constant 0 : i32
    %c0_i32_0 = arith.constant 0 : i32
    return %arg0, %c0_i32 : i32, i32
  }
}

</mosaic_0001>

<bundles_post_ra>
// kernel: tpu_custom_call.1
= control target key start
LH: loop header
LB: loop body
LE: loop exit
PB: predicated region body
PF: predicated region fallthrough
CT: control target
= control target key end

     0   :  { %s3018_s0 = inlined_call_operand.hbm [shape: f32[16,32], index: 0, kind: input, shape index: {}]   ;;  %s3019_s1 = inlined_call_operand.hbm [shape: f32[8,32], index: 1, kind: input, shape index: {}]   ;;  %s3020_s2 = inlined_call_operand.vmem [shape: f32[1,32,96], index: 2, kind: input, shape index: {}]   ;;  %s3021_s3 = inlined_call_operand.vmem [shape: f32[1,1,96], index: 3, kind: input, shape index: {}]   ;;  %s3022_s4 = inlined_call_operand.vmem [shape: f32[1,32,32], index: 4, kind: input, shape index: {}]   ;;  %s3023_s5 = inlined_call_operand.vmem [shape: f32[1,1,32], index: 5, kind: input, shape index: {}]   ;;  %s3024_s6 = inlined_call_operand.vmem [shape: f32[1,1,32], index: 6, kind: input, shape index: {}]   ;;  %s3025_s7 = inlined_call_operand.vmem [shape: f32[1,1,32], index: 7, kind: input, shape index: {}]   ;;  %s3026_s8 = inlined_call_operand.vmem [shape: f32[1,32,64], index: 8, kind: input, shape index: {}]   ;;  %s3027_s9 = inlined_call_operand.vmem [shape: f32[1,1,64], index: 9, kind: input, shape index: {}]   ;;  %s3028_s10 = inlined_call_operand.vmem [shape: f32[1,64,32], index: 10, kind: input, shape index: {}]   ;;  %s3029_s11 = inlined_call_operand.vmem [shape: f32[1,1,32], index: 11, kind: input, shape index: {}]   ;;  %s3030_s12 = inlined_call_operand.vmem [shape: f32[1,1,32], index: 12, kind: input, shape index: {}]   ;;  %s3031_s13 = inlined_call_operand.vmem [shape: f32[1,1,32], index: 13, kind: input, shape index: {}]   ;;  %s3032_s14 = inlined_call_operand.vmem [shape: f32[1,32], index: 14, kind: input, shape index: {}]   ;;  %s3033_s15 = inlined_call_operand.vmem [shape: f32[1,32], index: 15, kind: input, shape index: {}]   ;;  %s3034_s16 = inlined_call_operand.hbm [shape: f32[16,32], index: 16, kind: output, shape index: {}]  }
   0x1   :  { %3037 = sst [smem:[#allocation11_spill]] %s3018_s0 }
   0x2   :  { %3038 = sst [smem:[#allocation12_spill]] %s3034_s16 }
   0x3   :  { %21 = vsyncpa [#allocation3], 0 }
   0x4   :  { %22 = vsyncpa [#allocation6], 0 }
   0x5   :  { %23 = vsyncpa [#allocation4], 0  ;;  %s2617_s21 = smov [#allocation2]   ;;  %s3039_s25 = sld [smem:[#allocation11_spill]] }
   0x6   :  { %s29_s22 = sshll.u32 %s2617_s21, 4  ;;  %s30_s22 = int_to_ptr.vmem [resolvable:$true] %s29_s22 }
   0xb   :  { %s2545_s26 = scalar_lea.hbm %s3039_s25, 256 }
   0xc   :  { %p2546_p0 = scmp.ne.s32.totalorder %s3039_s25, %s2545_s26  ;;  %p2549_p1 = scmp.lt.u32.totalorder %s2545_s26, %s3039_s25 }
   0xe   :  { %p2551_p2 = pnand %p2549_p1, %p2546_p0 }
  0x10   :  { %2554 = shalt.err (!%p2551_p2)
}
  0x11   :  { %s2555_s0 = scalar_lea.vmem %s30_s22, 256  ;;  %p2560_p4 = scmp.lt.s32.totalorder %s30_s22, %s30_s22 }
  0x12   :  { %p2556_p3 = scmp.ne.s32.totalorder %s30_s22, %s2555_s0  ;;  %p2561_p5 = scmp.lt.s32.totalorder %s2555_s0, %s2555_s0 }
  0x14   :  { %p2562_p6 = por %p2561_p5, %p2560_p4 }
  0x16   :  { %p2563_p7 = pnand %p2562_p6, %p2556_p3 }
  0x18   :  { %2566 = shalt.err (!%p2563_p7)
}
  0x19   :  { %s2618_s17 = smov 128   ;;  %s2619_s18 = smov 8  }
  0x1a   :  { %35 = dma.hbm_to_vmem [thread:$0]  %s3039_s25, 256, %s30_s22, [#allocation3], %s2618_s17, %s2618_s17, %s2619_s18  }
  0x1b   :  { %s2620_s21 = smov [#allocation5]   ;;  %s2567_s27 = scalar_lea.hbm %s3019_s1, 128 }
  0x1c   :  { %s42_s23 = sshll.u32 %s2620_s21, 4  ;;  %p2568_p8 = scmp.ne.s32.totalorder %s3019_s1, %s2567_s27  ;;  %s43_s23 = int_to_ptr.vmem [resolvable:$true] %s42_s23 }
  0x1d   :  { %p2571_p9 = scmp.lt.u32.totalorder %s2567_s27, %s3019_s1 }
  0x1f   :  { %p2573_p10 = pnand %p2571_p9, %p2568_p8 }
  0x21   :  { %2576 = shalt.err (!%p2573_p10)
}
  0x22   :  { %s2577_s16 = scalar_lea.vmem %s43_s23, 128  ;;  %p2582_p12 = scmp.lt.s32.totalorder %s43_s23, %s43_s23 }
  0x23   :  { %p2578_p11 = scmp.ne.s32.totalorder %s43_s23, %s2577_s16  ;;  %p2583_p13 = scmp.lt.s32.totalorder %s2577_s16, %s2577_s16 }
  0x25   :  { %p2584_p0 = por %p2583_p13, %p2582_p12 }
  0x27   :  { %p2585_p1 = pnand %p2584_p0, %p2578_p11 }
  0x29   :  { %2588 = shalt.err (!%p2585_p1)
}
  0x2a   :  { %45 = dma.hbm_to_vmem [thread:$0]  %s3019_s1, 128, %s43_s23, [#allocation6]  }
  0x2b   :  { %2611 = dma.done.wait [#allocation3], 256  }
  0x2c   :  { %2612 = vsyncadd [#allocation3], 4294967040 }
  0x2d   :  { %2613 = dma.done.wait [#allocation6], 128  }
  0x2e   :  { %2614 = vsyncadd [#allocation6], 4294967168  ;;  %v85_v0 = vld [vmem:[%s3020_s2] sm:$0xff]  ;;  %v86_v1 = vld [vmem:[%s3020_s2 + $0x8] sm:$0xff]  ;;  %vm96_vm0 = vcmask 261120   ;;  %v2621_v11 = vmov 0.0  }
  0x2f   :  { %v87_v2 = vld [vmem:[%s3020_s2 + $0x10] sm:$0xff]  ;;  %v2445_v3 = vpack.c.bf16 %v86_v1, %v85_v0  ;;  %v88_v4 = vld [vmem:[%s3020_s2 + $0x18] sm:$0xff]  ;;  %v80_v5 = vld [vmem:[#allocation2] sm:$0xff]  ;;  %2325 = vmatprep.subr.mxu0 %v2621_v11  ;;  %vm2622_vm1 = vmmov 0   ;;  %s2623_s23 = smov 96   ;;  %s2624_s29 = smov 64  }
  0x30   :  { %v2449_v6 = vpack.c.bf16 %v88_v4, %v87_v2  ;;  %v82_v7 = vld [vmem:[#allocation5] sm:$0xff]  ;;  %v81_v9 = vld [vmem:[#allocation2 + $0x8] sm:$0xff]  ;;  %2327 = vmatprep.mubr.msk.f32.mxu0 %vm2622_vm1, %v2621_v11  ;;  %v2190_v12 = vld [vmem:[%s3021_s3] ss:$0 sm:$0xff]  ;;  %s2625_s30 = smov 120   ;;  %vm187_vm2 = vcmask 64512  }
  0x31   :  { %2446 = vmatprep.subr.bf16.mxu1 %v2445_v3  ;;  %v2759_v8 = vadd.f32 %v82_v7, %v80_v5  ;;  %v2763_v10 = vadd.f32 %v82_v7, %v81_v9  ;;  %s2626_s3 = smov 88   ;;  %s2627_s0 = smov 80   ;;  %vm1998_vm3 = vcmask 523264  }
  0x32   :  { %2448 = vmatpush3.bf16.msra.mxu1 %v2445_v3  ;;  %s2628_s22 = smov 56   ;;  %s2629_s25 = smov 112  }
  0x33   :  { %2450 = vmatprep.subr.bf16.mxu1 %v2449_v6  ;;  %2312 = vmatprep.mubr.msk.f32.mxu1 %vm96_vm0, %v2759_v8  ;;  %s2630_s19 = smov 48   ;;  %s2631_s20 = smov 72  }
  0x34   :  { %s2632_s21 = smov 104   ;;  %s2633_s2 = smov 40  }
  0x35   :  { %s2634_s1 = smov [#allocation7]  }
  0x36   :  { %2452 = vmatpush3.bf16.msra.mxu1 %v2449_v6 }
  0x37   :  { %2315 = vmatprep.subr.mxu1 %v2621_v11 }
  0x39   :  { %2313 = vmatmul.mubr.msk.f32.vlgmr.msra.gmra.mrb[0].mxu1 %vm96_vm0, %v2763_v10 }
  0x3a   :  { %2317 = vmatprep.mubr.msk.f32.mxu1 %vm2622_vm1, %v2621_v11 }
 0x10c   :  { %v2314_v13 = vpop.f32.mrb[0].mxu1 }
 0x10d   :  { %v169_v14 = vpop.f32.mrb[1].mxu1  ;;  %v2779_v16 = vadd.f32 %v2314_v13, %v2190_v12 }
 0x10e   :  { %v2776_v15 = vadd.f32 %v2190_v12, %v169_v14 }
 0x10f   :  { %v2784_v17 = vmul.f32 0.35355338, %v2779_v16 }
 0x110   :  { %185 = vrot.lane.b32.xlu0 %v2776_v15, %s2623_s23  ;;  %v2790_v19 = vmul.f32 0.35355338, %v2776_v15 }
 0x114   :  { %264 = vrot.lane.b32.xlu0 %v2779_v16, %s2623_s23 }
 0x118   :  { %439 = vrot.lane.b32.xlu0 %v2779_v16, %s2624_s29 }
 0x11c   :  { %593 = vrot.lane.b32.xlu0 %v2784_v17, %s2625_s30 }
 0x182   :  { %v186_v18 = vpop.permute.xlu0 %185 }
 0x183   :  { %2316 = vmatpush3.xpose.msk.msra.mxu1 %vm187_vm2, %v186_v18 }
 0x184   :  { %2320 = vmatprep.subr.mxu1 %v2621_v11 }
 0x186   :  { %v265_v20 = vpop.permute.xlu0 %264  ;;  %2318 = vmatmul.mubr.msk.f32.vlgmr.msra.gmra.mrb[2].mxu1 %vm187_vm2, %v2790_v19 }
 0x187   :  { %2321 = vmatpush3.xpose.msk.msra.mxu1 %vm187_vm2, %v265_v20  ;;  %2322 = vmatprep.mubr.msk.f32.mxu1 %vm2622_vm1, %v2621_v11 }
 0x188   :  { %2330 = vmatprep.subr.mxu1 %v2621_v11 }
 0x18a   :  { %v440_v21 = vpop.permute.xlu0 %439  ;;  %2323 = vmatmul.mubr.msk.f32.vlgmr.msra.gmra.mrb[4].mxu1 %vm187_vm2, %v2784_v17 }
 0x18b   :  { %2331 = vmatpush3.msra.mxu1 %v440_v21  ;;  %2332 = vmatprep.mubr.msk.f32.mxu1 %vm2622_vm1, %v2621_v11 }
 0x18c   :  { %2340 = vmatprep.subr.mxu1 %v2621_v11 }
 0x18e   :  { %v594_v28 = vpop.permute.xlu0 %593 }
 0x259   :  { %v259_v22 = vpop.f32.mrb[2].mxu1 }
 0x25a   :  { %v2319_v23 = vpop.f32.mrb[3].mxu1  ;;  %v341_v24 = vsel %vm187_vm2, %v259_v22, -inf }
 0x25b   :  { %342 = vmax.xlane.f32.xlu0 %v341_v24  ;;  %v180_v23 = vld [vmem:[%s3022_s4] sm:$0xff] }
 0x25d   :  { %v337_v25 = vpop.f32.mrb[4].mxu1 }
 0x25e   :  { %v2324_v26 = vpop.f32.mrb[5].mxu1  ;;  %v344_v27 = vsel %vm187_vm2, %v337_v25, -inf }
 0x25f   :  { %345 = vmax.xlane.f32.xlu1 %v344_v27 }
 0x271   :  { %363 = vrot.lane.b32.xlu0 %v2776_v15, %s2624_s29 }
 0x275   :  { %515 = vrot.lane.b32.xlu0 %v2790_v19, %s2625_s30 }
 0x2e8   :  { %v343_v29 = vpop.xlane.xlu0 %342 }
 0x2e9   :  { %v347_v36 = vsub.f32 %v259_v22, %v343_v29  ;;  %v181_v22 = vld [vmem:[%s3022_s4 + $0x8] sm:$0xff] }
 0x2eb   :  { %v349_v37 = vmul.f32 1.442695, %v347_v36 }
 0x2ec   :  { %v364_v30 = vpop.permute.xlu0 %363  ;;  %v346_v31 = vpop.xlane.xlu1 %345 }
 0x2ed   :  { %v348_v32 = vsub.f32 %v337_v25, %v346_v31  ;;  %2326 = vmatpush3.msra.mxu0 %v364_v30 }
 0x2ee   :  { %2335 = vmatprep.subr.mxu0 %v2621_v11 }
 0x2ef   :  { %v351_v33 = vmul.f32 1.442695, %v348_v32 }
 0x2f0   :  { %v516_v48 = vpop.permute.xlu0 %515 }
 0x2f1   :  { %2501 = vpow2.f32 %v351_v33 }
 0x2f2   :  { %2503 = vpow2.f32 %v349_v37 }
 0x2fb   :  { %v2502_v34 = vpop.eup %2501 }
 0x2fc   :  { %v356_v35 = vsel %vm187_vm2, %v2502_v34, 0.0  ;;  %v2504_v38 = vpop.eup %2503 }
 0x2fd   :  { %357 = vadd.xlane.f32.xlu1 %v356_v35  ;;  %v353_v39 = vsel %vm187_vm2, %v2504_v38, 0.0 }
 0x30e   :  { %595 = vrot.lane.b32.xlu1 %v2779_v16, %s2626_s3 }
 0x332   :  { %354 = vadd.xlane.f32.xlu1 %v353_v39 }
 0x343   :  { %517 = vrot.lane.b32.xlu1 %v2776_v15, %s2626_s3 }
 0x347   :  { %1009 = vrot.lane.b32.xlu1 %v2776_v15, %s2627_s0 }
 0x38a   :  { %v358_v40 = vpop.xlane.xlu1 %357 }
 0x38b   :  { %2505 = vrcp.f32 %v358_v40 }
 0x38e   :  { %v596_v43 = vpop.permute.xlu1 %595 }
 0x395   :  { %v2506_v41 = vpop.eup %2505 }
 0x396   :  { %v362_v42 = vmul.f32 %v2506_v41, %v2502_v34 }
 0x398   :  { %2333 = vmatmul.mubr.msk.f32.vlgmr.msra.gmra.mrb[6].mxu1 %vm187_vm2, %v362_v42 }
 0x399   :  { %2341 = vmatpush3.xpose.msk.msra.mxu1 %vm187_vm2, %v596_v43  ;;  %2342 = vmatprep.mubr.msk.f32.mxu1 %vm2622_vm1, %v2621_v11 }
 0x39a   :  { %2350 = vmatprep.subr.mxu1 %v2621_v11 }
 0x39c   :  { %2343 = vmatmul.mubr.msk.f32.vlgmr.msra.gmra.mrb[8].mxu1 %vm187_vm2, %v594_v28 }
 0x39d   :  { %2352 = vmatprep.mubr.msk.f32.mxu1 %vm2622_vm1, %v2621_v11 }
 0x3bf   :  { %v355_v44 = vpop.xlane.xlu1 %354 }
 0x3c0   :  { %2507 = vrcp.f32 %v355_v44 }
 0x3c3   :  { %v518_v47 = vpop.permute.xlu1 %517 }
 0x3c7   :  { %v1010_v12 = vpop.permute.xlu1 %1009 }
 0x3ca   :  { %v2508_v45 = vpop.eup %2507 }
 0x3cb   :  { %v361_v46 = vmul.f32 %v2508_v45, %v2504_v38  ;;  %v182_v45 = vld [vmem:[%s3022_s4 + $0x10] sm:$0xff] }
 0x3cd   :  { %2328 = vmatmul.mubr.msk.f32.vlgmr.msra.gmra.mrb[0].mxu0 %vm187_vm2, %v361_v46 }
 0x3ce   :  { %2336 = vmatpush3.xpose.msk.msra.mxu0 %vm187_vm2, %v518_v47  ;;  %2337 = vmatprep.mubr.msk.f32.mxu0 %vm2622_vm1, %v2621_v11 }
 0x3cf   :  { %2345 = vmatprep.subr.mxu0 %v2621_v11 }
 0x3d1   :  { %2338 = vmatmul.mubr.msk.f32.vlgmr.msra.gmra.mrb[2].mxu0 %vm187_vm2, %v516_v48 }
 0x3d2   :  { %2347 = vmatprep.mubr.msk.f32.mxu0 %vm2622_vm1, %v2621_v11 }
 0x46b   :  { %v2830_v49 = vpop.f32.mrb[6].mxu1 }
 0x46c   :  { %v2334_v50 = vpop.f32.mrb[7].mxu1 }
 0x46f   :  { %v667_v51 = vpop.f32.mrb[8].mxu1 }
 0x470   :  { %v2344_v52 = vpop.f32.mrb[9].mxu1  ;;  %v674_v53 = vsel %vm187_vm2, %v667_v51, -inf }
 0x471   :  { %675 = vmax.xlane.f32.xlu0 %v674_v53 }
 0x487   :  { %769 = vrot.lane.b32.xlu0 %v2779_v16, %s2628_s22 }
 0x48b   :  { %1007 = vrot.lane.b32.xlu0 %v2790_v19, %s2629_s25 }
 0x48f   :  { %1087 = vrot.lane.b32.xlu0 %v2779_v16, %s2627_s0 }
 0x4a0   :  { %v2837_v54 = vpop.f32.mrb[0].mxu0 }
 0x4a1   :  { %v2329_v55 = vpop.f32.mrb[1].mxu0 }
 0x4a4   :  { %v589_v56 = vpop.f32.mrb[2].mxu0 }
 0x4a5   :  { %v2339_v57 = vpop.f32.mrb[3].mxu0  ;;  %v671_v58 = vsel %vm187_vm2, %v589_v56, -inf }
 0x4ae   :  { %672 = vmax.xlane.f32.xlu0 %v671_v58 }
 0x4c4   :  { %693 = vrot.lane.b32.xlu0 %v2776_v15, %s2628_s22 }
 0x4c8   :  { %1185 = vrot.lane.b32.xlu0 %v2776_v15, %s2630_s19 }
 0x4cc   :  { %1422 = vrot.lane.b32.xlu0 %v2776_v15, %s2631_s20 }
 0x4d0   :  { %1500 = vrot.lane.b32.xlu0 %v2779_v16, %s2631_s20 }
 0x4d4   :  { %1420 = vrot.lane.b32.xlu0 %v2790_v19, %s2632_s21 }
 0x4d8   :  { %1498 = vrot.lane.b32.xlu0 %v2784_v17, %s2632_s21 }
 0x4fe   :  { %v676_v59 = vpop.xlane.xlu0 %675 }
 0x4ff   :  { %v678_v60 = vsub.f32 %v667_v51, %v676_v59 }
 0x501   :  { %v681_v61 = vmul.f32 1.442695, %v678_v60 }
 0x502   :  { %v770_v62 = vpop.permute.xlu0 %769 }
 0x503   :  { %2509 = vpow2.f32 %v681_v61  ;;  %2351 = vmatpush3.msra.mxu1 %v770_v62 }
 0x504   :  { %2365 = vmatprep.subr.mxu1 %v2621_v11 }
 0x506   :  { %v1008_v1 = vpop.permute.xlu0 %1007 }
 0x50a   :  { %v1088_v2 = vpop.permute.xlu0 %1087 }
 0x50d   :  { %v2510_v63 = vpop.eup %2509 }
 0x50e   :  { %v686_v0 = vsel %vm187_vm2, %v2510_v63, 0.0 }
 0x50f   :  { %687 = vadd.xlane.f32.xlu1 %v686_v0 }
 0x520   :  { %1085 = vrot.lane.b32.xlu1 %v2784_v17, %s2629_s25 }
 0x53b   :  { %v673_v3 = vpop.xlane.xlu0 %672 }
 0x53c   :  { %v677_v4 = vsub.f32 %v589_v56, %v673_v3 }
 0x53e   :  { %v679_v5 = vmul.f32 1.442695, %v677_v4 }
 0x53f   :  { %v694_v6 = vpop.permute.xlu0 %693 }
 0x540   :  { %2511 = vpow2.f32 %v679_v5  ;;  %2346 = vmatpush3.msra.mxu0 %v694_v6 }
 0x541   :  { %2355 = vmatprep.subr.mxu0 %v181_v22 }
 0x543   :  { %v1186_v34 = vpop.permute.xlu0 %1185 }
 0x54a   :  { %v2512_v7 = vpop.eup %2511 }
 0x54b   :  { %v683_v9 = vsel %vm187_vm2, %v2512_v7, 0.0 }
 0x54c   :  { %684 = vadd.xlane.f32.xlu1 %v683_v9 }
 0x59c   :  { %v688_v13 = vpop.xlane.xlu1 %687 }
 0x59d   :  { %2513 = vrcp.f32 %v688_v13 }
 0x5a0   :  { %v1086_v17 = vpop.permute.xlu1 %1085 }
 0x5a7   :  { %v2514_v14 = vpop.eup %2513 }
 0x5a8   :  { %v692_v18 = vmul.f32 %v2514_v14, %v2510_v63 }
 0x5aa   :  { %2353 = vmatmul.mubr.msk.f32.vlgmr.msra.gmra.mrb[10].mxu1 %vm187_vm2, %v692_v18 }
 0x5ab   :  { %2366 = vmatpush3.xpose.msk.msra.mxu1 %vm187_vm2, %v1010_v12  ;;  %2367 = vmatprep.mubr.msk.f32.mxu1 %vm2622_vm1, %v2621_v11 }
 0x5ac   :  { %2370 = vmatprep.subr.mxu1 %v2621_v11 }
 0x5ae   :  { %2368 = vmatmul.mubr.msk.f32.vlgmr.msra.gmra.mrb[12].mxu1 %vm187_vm2, %v1008_v1 }
 0x5af   :  { %2371 = vmatpush3.xpose.msk.msra.mxu1 %vm187_vm2, %v1088_v2  ;;  %2372 = vmatprep.mubr.msk.f32.mxu1 %vm2622_vm1, %v2621_v11 }
 0x5b0   :  { %2380 = vmatprep.subr.mxu1 %v2621_v11 }
 0x5b2   :  { %2373 = vmatmul.mubr.msk.f32.vlgmr.msra.gmra.mrb[14].mxu1 %vm187_vm2, %v1086_v17 }
 0x5b3   :  { %2382 = vmatprep.mubr.msk.f32.mxu1 %vm2622_vm1, %v2621_v11 }
 0x5d9   :  { %v685_v19 = vpop.xlane.xlu1 %684 }
 0x5da   :  { %2515 = vrcp.f32 %v685_v19 }
 0x5e4   :  { %v2516_v20 = vpop.eup %2515 }
 0x5e5   :  { %v691_v21 = vmul.f32 %v2516_v20, %v2512_v7 }
 0x5e7   :  { %2348 = vmatmul.mubr.msk.f32.vlgmr.msra.gmra.mrb[4].mxu0 %vm187_vm2, %v691_v21 }
 0x5e8   :  { %2356 = vmatpush3.msra.mxu0 %v181_v22 }
 0x5e9   :  { %2360 = vmatprep.subr.mxu0 %v180_v23 }
 0x67d   :  { %v841_v24 = vpop.f32.mrb[10].mxu1 }
 0x67e   :  { %v2354_v25 = vpop.f32.mrb[11].mxu1 }
 0x681   :  { %v1081_v26 = vpop.f32.mrb[12].mxu1 }
 0x682   :  { %v2369_v27 = vpop.f32.mrb[13].mxu1  ;;  %v1163_v28 = vsel %vm187_vm2, %v1081_v26, -inf }
 0x683   :  { %1164 = vmax.xlane.f32.xlu1 %v1163_v28  ;;  %v2225_v28 = vld [vmem:[%s3023_s5] ss:$0 sm:$0xff] }
 0x685   :  { %v1159_v29 = vpop.f32.mrb[14].mxu1 }
 0x686   :  { %v2374_v30 = vpop.f32.mrb[15].mxu1  ;;  %v1166_v31 = vsel %vm187_vm2, %v1159_v29, -inf }
 0x687   :  { %1167 = vmax.xlane.f32.xlu1 %v1166_v31 }
 0x6ba   :  { %v765_v32 = vpop.f32.mrb[4].mxu0 }
 0x6bb   :  { %v2349_v33 = vpop.f32.mrb[5].mxu0  ;;  %2357 = vmatprep.mubr.msk.f32.mxu0 %vm187_vm2, %v765_v32 }
 0x6bc   :  { %2358 = vmatmul.mubr.msk.f32.vlgmr.msra.gmra.mrb[6].mxu0 %vm187_vm2, %v841_v24 }
 0x6bd   :  { %2362 = vmatprep.mubr.msk.f32.mxu0 %vm187_vm2, %v2837_v54  ;;  %2361 = vmatpush3.msra.mxu0 %v180_v23 }
 0x6be   :  { %2375 = vmatprep.subr.mxu0 %v2621_v11 }
 0x6c4   :  { %2363 = vmatmul.mubr.msk.f32.vlgmr.msra.gmra.mrb[6].mxu0 %vm187_vm2, %v2830_v49  ;;  %v1423_v49 = vpop.permute.xlu0 %1422 }
 0x6c5   :  { %2376 = vmatpush3.msra.mxu0 %v1186_v34  ;;  %2377 = vmatprep.mubr.msk.f32.mxu0 %vm2622_vm1, %v2621_v11 }
 0x6c6   :  { %2385 = vmatprep.subr.mxu0 %v182_v45 }
 0x6c8   :  { %v1501_v53 = vpop.permute.xlu0 %1500 }
 0x6cc   :  { %v1421_v55 = vpop.permute.xlu0 %1420 }
 0x6d0   :  { %v1499_v60 = vpop.permute.xlu0 %1498 }
 0x710   :  { %v1165_v35 = vpop.xlane.xlu1 %1164 }
 0x711   :  { %v1169_v36 = vsub.f32 %v1081_v26, %v1165_v35 }
 0x713   :  { %v1171_v37 = vmul.f32 1.442695, %v1169_v36 }
 0x714   :  { %v1168_v38 = vpop.xlane.xlu1 %1167 }
 0x715   :  { %2517 = vpow2.f32 %v1171_v37  ;;  %v1170_v39 = vsub.f32 %v1159_v29, %v1168_v38 }
 0x717   :  { %v1173_v40 = vmul.f32 1.442695, %v1170_v39 }
 0x719   :  { %2519 = vpow2.f32 %v1173_v40 }
 0x71f   :  { %v2518_v41 = vpop.eup %2517 }
 0x720   :  { %v1175_v42 = vsel %vm187_vm2, %v2518_v41, 0.0 }
 0x721   :  { %1176 = vadd.xlane.f32.xlu1 %v1175_v42 }
 0x723   :  { %v2520_v43 = vpop.eup %2519 }
 0x724   :  { %v1178_v44 = vsel %vm187_vm2, %v2520_v43, 0.0 }
 0x725   :  { %1179 = vadd.xlane.f32.xlu1 %v1178_v44 }
 0x736   :  { %1261 = vrot.lane.b32.xlu1 %v2779_v16, %s2630_s19 }
 0x7ae   :  { %v1177_v46 = vpop.xlane.xlu1 %1176 }
 0x7af   :  { %2521 = vrcp.f32 %v1177_v46  ;;  %v1890_v46 = vld [vmem:[%s3026_s8 + $0x8] sm:$0xff] }
 0x7b2   :  { %v1180_v47 = vpop.xlane.xlu1 %1179 }
 0x7b3   :  { %2523 = vrcp.f32 %v1180_v47 }
 0x7b6   :  { %v1262_v48 = vpop.permute.xlu1 %1261 }
 0x7b7   :  { %2381 = vmatpush3.msra.mxu1 %v1262_v48  ;;  %v1891_v48 = vld [vmem:[%s3026_s8 + $0x10] sm:$0xff] }
 0x7b8   :  { %2390 = vmatprep.subr.mxu1 %v2621_v11 }
 0x7b9   :  { %v2522_v50 = vpop.eup %2521 }
 0x7ba   :  { %v1183_v51 = vmul.f32 %v2522_v50, %v2518_v41 }
 0x7bc   :  { %2378 = vmatmul.mubr.msk.f32.vlgmr.msra.gmra.mrb[8].mxu0 %vm187_vm2, %v1183_v51  ;;  %v1983_v51 = vld [vmem:[%s3028_s10] sm:$0xff] }
 0x7bd   :  { %v2524_v52 = vpop.eup %2523  ;;  %2386 = vmatpush3.msra.mxu0 %v182_v45 }
 0x7be   :  { %v1184_v54 = vmul.f32 %v2524_v52, %v2520_v43  ;;  %2395 = vmatprep.subr.mxu0 %v2621_v11  ;;  %v1984_v52 = vld [vmem:[%s3028_s10 + $0x8] sm:$0xff] }
 0x7c0   :  { %2383 = vmatmul.mubr.msk.f32.vlgmr.msra.gmra.mrb[16].mxu1 %vm187_vm2, %v1184_v54  ;;  %v2461_v54 = vpack.c.bf16 %v1984_v52, %v1983_v51  ;;  %v2235_v51 = vld [vmem:[%s3031_s13] ss:$0 sm:$0xff] }
 0x7c1   :  { %2391 = vmatpush3.xpose.msk.msra.mxu1 %vm187_vm2, %v1423_v49  ;;  %2392 = vmatprep.mubr.msk.f32.mxu1 %vm2622_vm1, %v2621_v11  ;;  %v1892_v49 = vld [vmem:[%s3026_s8 + $0x18] sm:$0xff] }
 0x7c2   :  { %2400 = vmatprep.subr.mxu1 %v2621_v11  ;;  %v2457_v50 = vpack.c.bf16 %v1892_v49, %v1891_v48  ;;  %v2234_v48 = vld [vmem:[%s3030_s12] ss:$0 sm:$0xff] }
 0x7c4   :  { %2393 = vmatmul.mubr.msk.f32.vlgmr.msra.gmra.mrb[18].mxu1 %vm187_vm2, %v1421_v55  ;;  %v1986_v55 = vld [vmem:[%s3028_s10 + $0x18] sm:$0xff] }
 0x7c5   :  { %2402 = vmatprep.mubr.msk.f32.mxu1 %vm2622_vm1, %v2621_v11 }
 0x88f   :  { %v1257_v56 = vpop.f32.mrb[8].mxu0 }
 0x890   :  { %v2379_v57 = vpop.f32.mrb[9].mxu0  ;;  %2387 = vmatprep.mubr.msk.f32.mxu0 %vm187_vm2, %v1257_v56 }
 0x891   :  { %v1987_v57 = vld [vmem:[%s3028_s10 + $0x20] sm:$0xff] }
 0x893   :  { %v1333_v58 = vpop.f32.mrb[16].mxu1 }
 0x894   :  { %v2384_v59 = vpop.f32.mrb[17].mxu1  ;;  %2388 = vmatmul.mubr.msk.f32.vlgmr.msra.gmra.mrb[6].mxu0 %vm187_vm2, %v1333_v58  ;;  %v1988_v58 = vld [vmem:[%s3028_s10 + $0x28] sm:$0xff] }
 0x895   :  { %2396 = vmatpush3.xpose.msk.msra.mxu0 %vm187_vm2, %v1501_v53  ;;  %2397 = vmatprep.mubr.msk.f32.mxu0 %vm2622_vm1, %v2621_v11  ;;  %v1985_v53 = vld [vmem:[%s3028_s10 + $0x10] sm:$0xff]  ;;  %v2469_v59 = vpack.c.bf16 %v1988_v58, %v1987_v57 }
 0x896   :  { %2405 = vmatprep.subr.mxu0 %v2621_v11  ;;  %v2465_v56 = vpack.c.bf16 %v1986_v55, %v1985_v53 }
 0x897   :  { %v1494_v61 = vpop.f32.mrb[18].mxu1 }
 0x898   :  { %v2394_v62 = vpop.f32.mrb[19].mxu1  ;;  %2398 = vmatmul.mubr.msk.f32.vlgmr.msra.gmra.mrb[10].mxu0 %vm187_vm2, %v1499_v60  ;;  %v1576_v63 = vsel %vm187_vm2, %v1494_v61, -inf }
 0x899   :  { %1577 = vmax.xlane.f32.xlu1 %v1576_v63  ;;  %2407 = vmatprep.mubr.msk.f32.mxu0 %vm2622_vm1, %v2621_v11 }
 0x926   :  { %v1578_v0 = vpop.xlane.xlu1 %1577 }
 0x927   :  { %v1582_v1 = vsub.f32 %v1494_v61, %v1578_v0 }
 0x929   :  { %v1584_v2 = vmul.f32 1.442695, %v1582_v1 }
 0x92b   :  { %2525 = vpow2.f32 %v1584_v2 }
 0x935   :  { %v2526_v6 = vpop.eup %2525 }
 0x936   :  { %v1588_v7 = vsel %vm187_vm2, %v2526_v6, 0.0 }
 0x96b   :  { %v1572_v3 = vpop.f32.mrb[10].mxu0 }
 0x96c   :  { %v2399_v4 = vpop.f32.mrb[11].mxu0  ;;  %v1579_v5 = vsel %vm187_vm2, %v1572_v3, -inf }
 0x96d   :  { %1580 = vmax.xlane.f32.xlu0 %v1579_v5 }
 0x971   :  { %1589 = vadd.xlane.f32.xlu0 %v1588_v7  ;;  %v2227_v7 = vld [vmem:[%s3025_s7] ss:$0 sm:$0xff] }
 0x987   :  { %1598 = vrot.lane.b32.xlu0 %v2776_v15, %s2633_s2  ;;  %v183_v15 = vld [vmem:[%s3022_s4 + $0x18] sm:$0xff] }
 0x9fa   :  { %v1581_v9 = vpop.xlane.xlu0 %1580 }
 0x9fb   :  { %v1583_v12 = vsub.f32 %v1572_v3, %v1581_v9  ;;  %v2226_v3 = vld [vmem:[%s3024_s6] ss:$0 sm:$0xff] }
 0x9fd   :  { %v1586_v13 = vmul.f32 1.442695, %v1583_v12 }
 0x9fe   :  { %v1590_v11 = vpop.xlane.xlu0 %1589 }
 0x9ff   :  { %2527 = vpow2.f32 %v1586_v13 }
 0xa00   :  { %2529 = vrcp.f32 %v1590_v11 }
 0xa02   :  { %v1599_v14 = vpop.permute.xlu0 %1598 }
 0xa03   :  { %2401 = vmatpush3.msra.mxu1 %v1599_v14  ;;  %v1989_v14 = vld [vmem:[%s3028_s10 + $0x30] sm:$0xff] }
 0xa09   :  { %v2528_v18 = vpop.eup %2527 }
 0xa0a   :  { %v2530_v17 = vpop.eup %2529  ;;  %v1591_v19 = vsel %vm187_vm2, %v2528_v18, 0.0 }
 0xa0b   :  { %v1596_v20 = vmul.f32 %v2530_v17, %v2526_v6  ;;  %1592 = vadd.xlane.f32.xlu1 %v1591_v19  ;;  %v2228_v19 = vld [vmem:[%s3027_s9] ss:$0 sm:$0xff] }
 0xa0d   :  { %2403 = vmatmul.mubr.msk.f32.vlgmr.msra.gmra.mrb[20].mxu1 %vm187_vm2, %v1596_v20 }
 0xa1c   :  { %1674 = vrot.lane.b32.xlu1 %v2779_v16, %s2633_s2  ;;  %s2177_s2 = sshll.u32 %s2634_s1, 4  ;;  %s2178_s2 = int_to_ptr.vmem [resolvable:$true] %s2177_s2 }
 0xa1d   :  { %p2594_p3 = scmp.lt.s32.totalorder %s2178_s2, %s2178_s2 }
 0xa98   :  { %v1593_v21 = vpop.xlane.xlu1 %1592 }
 0xa99   :  { %2531 = vrcp.f32 %v1593_v21 }
 0xa9c   :  { %v1675_v22 = vpop.permute.xlu1 %1674 }
 0xa9d   :  { %2406 = vmatpush3.msra.mxu0 %v1675_v22 }
 0xa9e   :  { %2410 = vmatprep.subr.mxu0 %v183_v15 }
 0xaa3   :  { %v2532_v23 = vpop.eup %2531 }
 0xaa4   :  { %v1597_v24 = vmul.f32 %v2532_v23, %v2528_v18  ;;  %v1990_v18 = vld [vmem:[%s3028_s10 + $0x38] sm:$0xff] }
 0xaa5   :  { %v2473_v17 = vpack.c.bf16 %v1990_v18, %v1989_v14  ;;  %v2236_v14 = vld [vmem:[%s3032_s14] ss:$0 sm:$0xff] }
 0xaa6   :  { %2408 = vmatmul.mubr.msk.f32.vlgmr.msra.gmra.mrb[12].mxu0 %vm187_vm2, %v1597_v24 }
 0xaa7   :  { %2411 = vmatpush3.msra.mxu0 %v183_v15 }
 0xaa8   :  { %2462 = vmatprep.subr.bf16.mxu0 %v2461_v54 }
 0xae0   :  { %v1670_v25 = vpop.f32.mrb[20].mxu1 }
 0xae1   :  { %v2404_v26 = vpop.f32.mrb[21].mxu1  ;;  %2412 = vmatprep.mubr.msk.f32.mxu0 %vm187_vm2, %v1670_v25  ;;  %v2231_v25 = vld [vmem:[%s3029_s11] ss:$0 sm:$0xff] }
 0xb79   :  { %v1746_v27 = vpop.f32.mrb[12].mxu0 }
 0xb7a   :  { %v2409_v16 = vpop.f32.mrb[13].mxu0  ;;  %2413 = vmatmul.mubr.msk.f32.vlgmr.msra.gmra.mrb[6].mxu0 %vm187_vm2, %v1746_v27 }
 0xb7b   :  { %2464 = vmatpush3.bf16.msra.mxu0 %v2461_v54 }
 0xb7c   :  { %2466 = vmatprep.subr.bf16.mxu0 %v2465_v56 }
 0xb7f   :  { %2468 = vmatpush3.bf16.msra.mxu0 %v2465_v56 }
 0xb80   :  { %2470 = vmatprep.subr.bf16.mxu0 %v2469_v59 }
 0xb83   :  { %2472 = vmatpush3.bf16.msra.mxu0 %v2469_v59 }
 0xb84   :  { %2474 = vmatprep.subr.bf16.mxu0 %v2473_v17 }
 0xb87   :  { %2476 = vmatpush3.bf16.msra.mxu0 %v2473_v17 }
 0xc4d   :  { %v2414_v29 = vpop.f32.mrb[6].mxu0 }
 0xc4e   :  { %v1841_v30 = vadd.f32 %v2414_v29, %v2225_v28  ;;  %v1822_v31 = vpop.f32.mrb[7].mxu0 }
 0xc4f   :  { %v1840_v32 = vadd.f32 %v2225_v28, %v1822_v31 }
 0xc50   :  { %v1843_v33 = vadd.f32 %v1841_v30, %v2763_v10 }
 0xc51   :  { %v1842_v34 = vadd.f32 %v1840_v32, %v2759_v8  ;;  %v1889_v8 = vld [vmem:[%s3026_s8] sm:$0xff]  ;;  %s2589_s8 = scalar_lea.vmem %s2178_s2, 256 }
 0xc52   :  { %v1849_v35 = vsel %vm96_vm0, %v1843_v33, 0.0  ;;  %v2453_v47 = vpack.c.bf16 %v1890_v46, %v1889_v8  ;;  %p2590_p2 = scmp.ne.s32.totalorder %s2178_s2, %s2589_s8  ;;  %p2595_p4 = scmp.lt.s32.totalorder %s2589_s8, %s2589_s8 }
 0xc53   :  { %1850 = vadd.xlane.f32.xlu0 %v1849_v35  ;;  %v1846_v36 = vsel %vm96_vm0, %v1842_v34, 0.0 }
 0xc54   :  { %1847 = vadd.xlane.f32.xlu1 %v1846_v36  ;;  %2454 = vmatprep.subr.bf16.mxu1 %v2453_v47  ;;  %p2596_p5 = por %p2595_p4, %p2594_p3 }
 0xc55   :  { %2456 = vmatpush3.bf16.msra.mxu1 %v2453_v47 }
 0xc56   :  { %2458 = vmatprep.subr.bf16.mxu1 %v2457_v50  ;;  %p2597_p6 = pnand %p2596_p5, %p2590_p2 }
 0xc59   :  { %2460 = vmatpush3.bf16.msra.mxu1 %v2457_v50 }
 0xce0   :  { %v1851_v37 = vpop.xlane.xlu0 %1850 }
 0xce1   :  { %v1854_v38 = vmul.f32 0.03125, %v1851_v37  ;;  %v1848_v39 = vpop.xlane.xlu1 %1847 }
 0xce2   :  { %v1853_v40 = vmul.f32 0.03125, %v1848_v39 }
 0xce3   :  { %v1856_v41 = vsub.f32 %v1843_v33, %v1854_v38 }
 0xce4   :  { %v1855_v42 = vsub.f32 %v1842_v34, %v1853_v40 }
 0xce5   :  { %v1858_v43 = vmul.f32 %v1856_v41, %v1856_v41 }
 0xce6   :  { %v1857_v44 = vmul.f32 %v1855_v42, %v1855_v42 }
 0xce7   :  { %v1862_v45 = vsel %vm96_vm0, %v1858_v43, 0.0 }
 0xce8   :  { %1863 = vadd.xlane.f32.xlu1 %v1862_v45  ;;  %v1859_v10 = vsel %vm96_vm0, %v1857_v44, 0.0 }
 0xce9   :  { %1860 = vadd.xlane.f32.xlu0 %v1859_v10 }
 0xd75   :  { %v1864_v60 = vpop.xlane.xlu1 %1863 }
 0xd76   :  { %v1866_v61 = vmul.f32 0.03125, %v1864_v60  ;;  %v1861_v62 = vpop.xlane.xlu0 %1860 }
 0xd77   :  { %v1865_v63 = vmul.f32 0.03125, %v1861_v62 }
 0xd78   :  { %v1868_v0 = vadd.f32 1e-05, %v1866_v61 }
 0xd79   :  { %v1867_v1 = vadd.f32 1e-05, %v1865_v63 }
 0xd7a   :  { %2533 = vrsqrt.f32 %v1868_v0 }
 0xd7b   :  { %2535 = vrsqrt.f32 %v1867_v1 }
 0xd84   :  { %v2534_v2 = vpop.eup %2533 }
 0xd85   :  { %v2536_v4 = vpop.eup %2535  ;;  %v1872_v5 = vmul.f32 %v2534_v2, %v1856_v41 }
 0xd86   :  { %v1871_v6 = vmul.f32 %v2536_v4, %v1855_v42 }
 0xd87   :  { %v1880_v9 = vmul.f32 %v2226_v3, %v1872_v5 }
 0xd88   :  { %v1879_v12 = vmul.f32 %v2226_v3, %v1871_v6 }
 0xd89   :  { %v1888_v11 = vadd.f32 %v2227_v7, %v1880_v9 }
 0xd8a   :  { %v1887_v13 = vadd.f32 %v2227_v7, %v1879_v12 }
 0xd8c   :  { %2423 = vmatprep.mubr.msk.f32.mxu1 %vm96_vm0, %v1887_v13 }
 0xd8d   :  { %2424 = vmatmul.mubr.msk.f32.vlgmr.msra.gmra.mrb[22].mxu1 %vm96_vm0, %v1888_v11 }
 0xe60   :  { %v2425_v20 = vpop.f32.mrb[22].mxu1 }
 0xe61   :  { %v1978_v21 = vadd.f32 %v2425_v20, %v2228_v19  ;;  %v1972_v15 = vpop.f32.mrb[23].mxu1  ;;  %v2237_v20 = vld [vmem:[%s3033_s15] ss:$0 sm:$0xff] }
 0xe62   :  { %v1973_v22 = vadd.f32 %v2228_v19, %v1972_v15 }
 0xe63   :  { %v1982_v24 = vmax.f32 %v1978_v21, 0.0 }
 0xe64   :  { %v1981_v23 = vmax.f32 %v1973_v22, 0.0 }
 0xe66   :  { %2442 = vmatprep.mubr.msk.f32.mxu0 %vm1998_vm3, %v1981_v23 }
 0xe67   :  { %2443 = vmatmul.mubr.msk.f32.vlgmr.msra.gmra.mrb[14].mxu0 %vm1998_vm3, %v1982_v24 }
 0xf3a   :  { %v2444_v26 = vpop.f32.mrb[14].mxu0 }
 0xf3b   :  { %v2077_v27 = vadd.f32 %v2444_v26, %v2231_v25  ;;  %v2071_v16 = vpop.f32.mrb[15].mxu0 }
 0xf3c   :  { %v2072_v28 = vadd.f32 %v2231_v25, %v2071_v16 }
 0xf3d   :  { %v2081_v29 = vadd.f32 %v2077_v27, %v1888_v11 }
 0xf3e   :  { %v2080_v30 = vadd.f32 %v2072_v28, %v1887_v13 }
 0xf3f   :  { %v2087_v31 = vsel %vm96_vm0, %v2081_v29, 0.0 }
 0xf40   :  { %2088 = vadd.xlane.f32.xlu1 %v2087_v31  ;;  %v2084_v32 = vsel %vm96_vm0, %v2080_v30, 0.0 }
 0xf41   :  { %2085 = vadd.xlane.f32.xlu0 %v2084_v32 }
 0xfcd   :  { %v2089_v33 = vpop.xlane.xlu1 %2088 }
 0xfce   :  { %v2091_v34 = vmul.f32 0.03125, %v2089_v33  ;;  %v2086_v35 = vpop.xlane.xlu0 %2085 }
 0xfcf   :  { %v2090_v36 = vmul.f32 0.03125, %v2086_v35 }
 0xfd0   :  { %v2093_v37 = vsub.f32 %v2081_v29, %v2091_v34 }
 0xfd1   :  { %v2092_v38 = vsub.f32 %v2080_v30, %v2090_v36 }
 0xfd2   :  { %v2095_v39 = vmul.f32 %v2093_v37, %v2093_v37 }
 0xfd3   :  { %v2094_v40 = vmul.f32 %v2092_v38, %v2092_v38 }
 0xfd4   :  { %v2099_v41 = vsel %vm96_vm0, %v2095_v39, 0.0 }
 0xfd5   :  { %2100 = vadd.xlane.f32.xlu1 %v2099_v41  ;;  %v2096_v42 = vsel %vm96_vm0, %v2094_v40, 0.0 }
 0xfd6   :  { %2097 = vadd.xlane.f32.xlu0 %v2096_v42 }
0x1062   :  { %v2101_v43 = vpop.xlane.xlu1 %2100 }
0x1063   :  { %v2103_v44 = vmul.f32 0.03125, %v2101_v43  ;;  %v2098_v45 = vpop.xlane.xlu0 %2097 }
0x1064   :  { %v2102_v10 = vmul.f32 0.03125, %v2098_v45 }
0x1065   :  { %v2105_v8 = vadd.f32 1e-05, %v2103_v44 }
0x1066   :  { %v2104_v46 = vadd.f32 1e-05, %v2102_v10 }
0x1067   :  { %2537 = vrsqrt.f32 %v2105_v8 }
0x1068   :  { %2539 = vrsqrt.f32 %v2104_v46 }
0x1071   :  { %v2538_v47 = vpop.eup %2537 }
0x1072   :  { %v2540_v49 = vpop.eup %2539  ;;  %v2109_v50 = vmul.f32 %v2538_v47, %v2093_v37 }
0x1073   :  { %v2108_v52 = vmul.f32 %v2540_v49, %v2092_v38 }
0x1074   :  { %v2117_v53 = vmul.f32 %v2234_v48, %v2109_v50 }
0x1075   :  { %v2116_v54 = vmul.f32 %v2234_v48, %v2108_v52 }
0x1076   :  { %v2125_v55 = vadd.f32 %v2235_v51, %v2117_v53 }
0x1077   :  { %v2124_v56 = vadd.f32 %v2235_v51, %v2116_v54 }
0x1078   :  { %v2131_v57 = vsel %vm96_vm0, %v2125_v55, 0.0 }
0x1079   :  { %2132 = vadd.xlane.f32.xlu1 %v2131_v57  ;;  %v2128_v58 = vsel %vm96_vm0, %v2124_v56, 0.0 }
0x107a   :  { %2129 = vadd.xlane.f32.xlu0 %v2128_v58 }
0x1106   :  { %v2133_v59 = vpop.xlane.xlu1 %2132 }
0x1107   :  { %v2135_v60 = vmul.f32 0.03125, %v2133_v59  ;;  %v2130_v61 = vpop.xlane.xlu0 %2129 }
0x1108   :  { %v2134_v62 = vmul.f32 0.03125, %v2130_v61 }
0x1109   :  { %v2137_v63 = vsub.f32 %v2125_v55, %v2135_v60 }
0x110a   :  { %v2136_v0 = vsub.f32 %v2124_v56, %v2134_v62 }
0x110b   :  { %v2139_v1 = vmul.f32 %v2137_v63, %v2137_v63 }
0x110c   :  { %v2138_v2 = vmul.f32 %v2136_v0, %v2136_v0 }
0x110d   :  { %v2143_v3 = vsel %vm96_vm0, %v2139_v1, 0.0 }
0x110e   :  { %2144 = vadd.xlane.f32.xlu1 %v2143_v3  ;;  %v2140_v4 = vsel %vm96_vm0, %v2138_v2, 0.0 }
0x110f   :  { %2141 = vadd.xlane.f32.xlu0 %v2140_v4 }
0x119b   :  { %v2145_v5 = vpop.xlane.xlu1 %2144 }
0x119c   :  { %v2147_v6 = vmul.f32 0.03125, %v2145_v5  ;;  %v2142_v7 = vpop.xlane.xlu0 %2141 }
0x119d   :  { %v2146_v9 = vmul.f32 0.03125, %v2142_v7 }
0x119e   :  { %v2149_v12 = vadd.f32 1e-05, %v2147_v6 }
0x119f   :  { %v2148_v13 = vadd.f32 1e-05, %v2146_v9 }
0x11a0   :  { %2541 = vrsqrt.f32 %v2149_v12 }
0x11a1   :  { %2543 = vrsqrt.f32 %v2148_v13 }
0x11aa   :  { %v2542_v11 = vpop.eup %2541 }
0x11ab   :  { %v2544_v18 = vpop.eup %2543  ;;  %v2153_v17 = vmul.f32 %v2542_v11, %v2137_v63 }
0x11ac   :  { %v2152_v19 = vmul.f32 %v2544_v18, %v2136_v0 }
0x11ad   :  { %v2161_v21 = vmul.f32 %v2236_v14, %v2153_v17 }
0x11ae   :  { %v2160_v15 = vmul.f32 %v2236_v14, %v2152_v19 }
0x11af   :  { %v2169_v22 = vadd.f32 %v2237_v20, %v2161_v21 }
0x11b0   :  { %v2168_v23 = vadd.f32 %v2237_v20, %v2160_v15 }
0x11b1   :  { %2171 = vst.msk [vmem:[#allocation7 + $0x8] sm:$0xff] %vm96_vm0, %v2169_v22 }
0x11b2   :  { %2170 = vst.msk [vmem:[#allocation7] sm:$0xff] %vm96_vm0, %v2168_v23 }
0x11b3   :  { %2600 = shalt.err (!%p2597_p6)
}
0x11b4   :  { %s3040_s23 = sld [smem:[#allocation12_spill]] }
0x11ba   :  { %s2601_s29 = scalar_lea.hbm %s3040_s23, 256 }
0x11bb   :  { %p2602_p7 = scmp.ne.s32.totalorder %s3040_s23, %s2601_s29  ;;  %p2605_p8 = scmp.lt.u32.totalorder %s2601_s29, %s3040_s23 }
0x11bd   :  { %p2607_p9 = pnand %p2605_p8, %p2602_p7 }
0x11bf   :  { %2610 = shalt.err (!%p2607_p9)
}
0x11c0   :  { %2183 = dma.vmem_to_hbm [thread:$0]  %s2178_s2, 256, %s3040_s23, [#allocation4], %s2618_s17, %s2618_s17, %s2619_s18  }
0x11c1   :  { %2615 = dma.done.wait [#allocation4], 256  }
0x11c2   :  { %2616 = vsyncadd [#allocation4], 4294967040 }
0x11c3   :  { %2187 = vsyncpa [#allocation3], 1 }
0x11c4   :  { %2188 = vsyncpa [#allocation6], 1 }
0x11c5   :  { %2189 = vsyncpa [#allocation4], 1 }

</bundles_post_ra>
